<compile_context>
chip_gen: v6e
topology: v6e:2x2x1
jax: 0.10.0
libtpu: 0.0.40
codegen_flags: <defaults>
</compile_context>

<pallas_src>
import functools

import jax
import jax.numpy as jnp
from jax.experimental import pallas as pl
from jax.experimental.pallas import tpu as pltpu


# --------------------------- hardware-aware helpers ---------------------------
def _vmem_limit_bytes():
    """Generation-specific VMEM request with headroom."""
    try:
        kind = jax.devices()[0].device_kind.lower()
    except Exception:
        kind = ""
    if "7" in kind:                      # v7x: 64 MiB physical per TC
        return 48 * 1024 * 1024
    return 100 * 1024 * 1024             # v5e / v6e (128 MiB physical)


def _pick_tile(dim, max_tile, align):
    """Largest aligned tile <= max_tile that divides dim (or full extent)."""
    if dim <= max_tile:
        return dim
    for t in range(max_tile, align - 1, -align):
        if dim % t == 0:
            return t
    return max_tile                      # fall back to edge tiles (cdiv grid)


def _pick_time_chunk(T, B, requested=None):
    """Chunk length that divides T and keeps Tc*B sublane-aligned."""
    tc = min(requested, T) if requested is not None else max(1, min(T, 512 // max(B, 1)))
    while tc > 1 and (T % tc != 0 or ((tc * B) % 8 != 0 and tc != T)):
        tc -= 1
    if (tc * B) % 8 != 0 and tc != T:
        tc = T                           # single full-extent chunk is always legal
    return tc


# ------------------------- fused LSTM stack kernel ---------------------------
def _lstm_stack_kernel(x_ref, wih_ref, whh_ref, b_ref, h0_ref, c0_ref,
                       y_ref, hT_ref, cT_ref,
                       proj_ref, act_ref, *, Tc, B, H, L, unroll):
    """One time-chunk of the whole LSTM layer stack.

    x_ref  : (Tc*B, E)   bf16  embedding chunk (time-major, flattened)
    wih_ref: (L, E, 4H)  bf16  input->gates weights (resident across grid)
    whh_ref: (L, H, 4H)  bf16  hidden->gates weights (resident across grid)
    b_ref  : (L, 1, 4H)  f32   b_ih + b_hh (resident)
    h0/c0  : (L, B, H)   f32   initial state (resident)
    y_ref  : (Tc*B, H)   bf16  last-layer hidden states for this chunk
    hT/cT  : (L, B, H)   f32   carried state (constant block index => VMEM
                               resident accumulator, written to HBM once)
    proj_ref: (Tc*B, 4H) f32   scratch: hoisted input projection
    act_ref : (Tc*B, H)  bf16  scratch: inter-layer activations
    """
    bf16 = jnp.bfloat16

    @pl.when(pl.program_id(0) == 0)
    def _():                                           # seed the carried state
        hT_ref[...] = h0_ref[...]
        cT_ref[...] = c0_ref[...]

    def run_layer(l, in_ref, out_ref):
        # Hoisted input projection: one MXU matmul for the whole time chunk.
        proj_ref[...] = jnp.dot(in_ref[...], wih_ref[l],
                                preferred_element_type=jnp.float32) + b_ref[l]
        whh_l = whh_ref[l]                             # (H, 4H) bf16
        h = hT_ref[l]                                  # (B, H) f32 carried
        c = cT_ref[l]

        def step(t, carry):
            h, c = carry
            off = pl.multiple_of(t * B, B)
            gates = proj_ref[pl.ds(off, B), :] + jnp.dot(
                h.astype(bf16), whh_l, preferred_element_type=jnp.float32)
            i = jax.nn.sigmoid(gates[:, 0 * H:1 * H])  # PyTorch order: i,f,g,o
            f = jax.nn.sigmoid(gates[:, 1 * H:2 * H])
            g = jnp.tanh(gates[:, 2 * H:3 * H])
            o = jax.nn.sigmoid(gates[:, 3 * H:4 * H])
            c = f * c + i * g                          # f32 cell state
            h = o * jnp.tanh(c)
            out_ref[pl.ds(off, B), :] = h.astype(out_ref.dtype)
            return h, c

        h, c = jax.lax.fori_loop(0, Tc, step, (h, c), unroll=unroll)
        hT_ref[l] = h
        cT_ref[l] = c

    # Static layer loop: intermediate layers chain through the bf16 VMEM
    # scratch (safe to overwrite after the hoisted projection consumed it);
    # only the last layer writes the y output block.
    for l in range(L):
        in_ref = x_ref if l == 0 else act_ref
        out_ref = y_ref if l == L - 1 else act_ref
        run_layer(l, in_ref, out_ref)


def lstm_stack(x2d, w_ih, w_hh, b, h0, c0, *, batch, time_chunk=None):
    """x2d: (T*B, E) bf16. w_ih/w_hh: (L, E|H, 4H) bf16. b: (L,1,4H) f32.
    h0, c0: (L, B, H) f32.  Returns y:(T*B, H) bf16, hT/cT:(L, B, H) f32."""
    NB, E = x2d.shape
    L, B, H = h0.shape
    assert batch == B and NB % B == 0
    T = NB // B
    Tc = _pick_time_chunk(T, B, time_chunk)
    num_chunks = T // Tc
    unroll = max(1, min(Tc, 8))

    kernel = functools.partial(_lstm_stack_kernel,
                               Tc=Tc, B=B, H=H, L=L, unroll=unroll)
    y, hT, cT = pl.pallas_call(
        kernel,
        grid=(num_chunks,),
        in_specs=[
            pl.BlockSpec((Tc * B, E), lambda t: (t, 0)),        # x chunk
            pl.BlockSpec((L, E, 4 * H), lambda t: (0, 0, 0)),   # w_ih (resident)
            pl.BlockSpec((L, H, 4 * H), lambda t: (0, 0, 0)),   # w_hh (resident)
            pl.BlockSpec((L, 1, 4 * H), lambda t: (0, 0, 0)),   # bias (resident)
            pl.BlockSpec((L, B, H), lambda t: (0, 0, 0)),       # h0
            pl.BlockSpec((L, B, H), lambda t: (0, 0, 0)),       # c0
        ],
        out_specs=(
            pl.BlockSpec((Tc * B, H), lambda t: (t, 0)),        # y chunk
            pl.BlockSpec((L, B, H), lambda t: (0, 0, 0)),       # hT (carried)
            pl.BlockSpec((L, B, H), lambda t: (0, 0, 0)),       # cT (carried)
        ),
        out_shape=(
            jax.ShapeDtypeStruct((T * B, H), jnp.bfloat16),
            jax.ShapeDtypeStruct((L, B, H), jnp.float32),
            jax.ShapeDtypeStruct((L, B, H), jnp.float32),
        ),
        scratch_shapes=[
            pltpu.VMEM((Tc * B, 4 * H), jnp.float32),           # hoisted proj
            pltpu.VMEM((Tc * B, H), jnp.bfloat16),              # inter-layer act
        ],
        compiler_params=pltpu.CompilerParams(
            dimension_semantics=("arbitrary",),                  # carried h/c
            vmem_limit_bytes=_vmem_limit_bytes()),
    )(x2d, w_ih, w_hh, b, h0, c0)
    return y, hT, cT


# -------------------- tied output projection (x @ emb^T + b) ------------------
def _tied_proj_kernel(x_ref, et_ref, b_ref, o_ref):
    # Embedding is pre-transposed to (H, tn): plain MXU matmul, no XLU transpose.
    o_ref[...] = jnp.dot(x_ref[...], et_ref[...],
                         preferred_element_type=jnp.float32) + b_ref[...]


def tied_projection(x_bf16, emb_t_bf16, bias):
    """x: (N,H) bf16, emb_t: (H,V) bf16, bias: (1,V) f32 -> logits (N,V) f32."""
    N, H = x_bf16.shape
    V = emb_t_bf16.shape[1]
    tm = _pick_tile(N, 512, 8)
    tn = _pick_tile(V, 512, 128)
    # Vocab tile on the OUTER axis: the (H, tn) embedding tile keeps a constant
    # block index across the inner row axis and is only fetched once per outer
    # step; the much smaller (tm, H) x tile is the one that gets re-fetched.
    grid = (pl.cdiv(V, tn), pl.cdiv(N, tm))

    return pl.pallas_call(
        _tied_proj_kernel,
        grid=grid,
        in_specs=[
            pl.BlockSpec((tm, H), lambda j, i: (i, 0)),
            pl.BlockSpec((H, tn), lambda j, i: (0, j)),
            pl.BlockSpec((1, tn), lambda j, i: (0, j)),
        ],
        out_specs=pl.BlockSpec((tm, tn), lambda j, i: (i, j)),
        out_shape=jax.ShapeDtypeStruct((N, V), jnp.float32),
        compiler_params=pltpu.CompilerParams(
            dimension_semantics=("parallel", "parallel"),
            vmem_limit_bytes=_vmem_limit_bytes()),
    )(x_bf16, emb_t_bf16, bias)


# --------------------------------- Decoder ------------------------------------
def init_decoder_params(key, vocab_size, emb_dim, hidden_dim, num_layers):
    # Weight tying (out_layer.weight = embedding.weight) requires emb_dim == hidden_dim.
    assert emb_dim == hidden_dim, "weight tying requires emb_dim == hidden_dim"
    keys = jax.random.split(key, 2 + 4 * num_layers)
    k = 1.0 / jnp.sqrt(hidden_dim)

    emb = jax.random.normal(keys[0], (vocab_size, emb_dim), jnp.float32)
    out_bias = jax.random.uniform(keys[1], (vocab_size,), jnp.float32, -k, k)

    w_ih, w_hh, b = [], [], []
    for l in range(num_layers):
        kw = keys[2 + 4 * l: 2 + 4 * (l + 1)]
        # stored pre-transposed: (in_dim, 4H) / (H, 4H); stacked over layers.
        w_ih.append(jax.random.uniform(kw[0], (emb_dim, 4 * hidden_dim),
                                       jnp.float32, -k, k))
        w_hh.append(jax.random.uniform(kw[1], (hidden_dim, 4 * hidden_dim),
                                       jnp.float32, -k, k))
        b_ih = jax.random.uniform(kw[2], (4 * hidden_dim,), jnp.float32, -k, k)
        b_hh = jax.random.uniform(kw[3], (4 * hidden_dim,), jnp.float32, -k, k)
        b.append((b_ih + b_hh)[None, :])

    params = {"embedding": emb, "out_bias": out_bias,
              "w_ih": jnp.stack(w_ih), "w_hh": jnp.stack(w_hh),
              "b": jnp.stack(b)}
    # Cached bf16 copies (avoid per-call casts / HBM transpose of the embedding).
    params["emb_bf16"] = emb.astype(jnp.bfloat16)               # (V, E) gather table
    params["emb_t_bf16"] = emb.T.astype(jnp.bfloat16)           # (E, V) tied proj RHS
    params["w_ih_bf16"] = params["w_ih"].astype(jnp.bfloat16)
    params["w_hh_bf16"] = params["w_hh"].astype(jnp.bfloat16)
    return params


def decoder_forward(params, input_idx, state, *, time_chunk=None):
    """input_idx: (T, B) int32; state: (h, c) each (num_layers, B, H)."""
    h0, c0 = state

    # embedding lookup (gather) -- plain-JAX glue, directly in bf16
    emb = jnp.take(params["emb_bf16"], input_idx, axis=0)        # (T, B, E) bf16
    T, B, E = emb.shape
    x2d = emb.reshape(T * B, E)

    y, hT, cT = lstm_stack(x2d, params["w_ih_bf16"], params["w_hh_bf16"],
                           params["b"], h0, c0,
                           batch=B, time_chunk=time_chunk)       # y: (T*B, H) bf16

    # tied output projection: logits = y @ embedding^T + bias
    logits = tied_projection(y, params["emb_t_bf16"],
                             params["out_bias"][None, :])        # (T*B, V) f32
    return logits, (hT, cT)


def init_hidden(num_layers, batch_size, hidden_dim):
    h = jnp.zeros((num_layers, batch_size, hidden_dim), jnp.float32)
    c = jnp.zeros((num_layers, batch_size, hidden_dim), jnp.float32)
    return (h, c)


# ------------------------------ pure-JAX reference ----------------------------
# Mirrors the kernel's numerics (bf16 matmul operands, f32 accumulation and
# f32 gate/cell math) so the comparison tolerance can stay tight.
def decoder_forward_ref(params, input_idx, state):
    bf16 = jnp.bfloat16
    h0, c0 = state
    num_layers = h0.shape[0]
    T, B = input_idx.shape
    H = h0.shape[-1]

    x = jnp.take(params["embedding"], input_idx, axis=0)
    hs, cs = [], []
    for l in range(num_layers):
        wih = params["w_ih"][l].astype(bf16)
        whh = params["w_hh"][l].astype(bf16)
        bias = params["b"][l]
        h, c = h0[l], c0[l]
        ys = []
        for t in range(T):
            gates = (jnp.dot(x[t].astype(bf16), wih,
                             preferred_element_type=jnp.float32)
                     + jnp.dot(h.astype(bf16), whh,
                               preferred_element_type=jnp.float32)
                     + bias)
            i = jax.nn.sigmoid(gates[:, 0 * H:1 * H])
            f = jax.nn.sigmoid(gates[:, 1 * H:2 * H])
            g = jnp.tanh(gates[:, 2 * H:3 * H])
            o = jax.nn.sigmoid(gates[:, 3 * H:4 * H])
            c = f * c + i * g
            h = o * jnp.tanh(c)
            ys.append(h)
        x = jnp.stack(ys, axis=0)
        hs.append(h)
        cs.append(c)

    logits = jax.lax.dot_general(
        x.reshape(T * B, H).astype(bf16), params["embedding"].astype(bf16),
        dimension_numbers=(((1,), (1,)), ((), ())),
        preferred_element_type=jnp.float32) + params["out_bias"][None, :]
    return logits, (jnp.stack(hs), jnp.stack(cs))


# ----------------------------------- main --------------------------------------
if __name__ == "__main__":
    # Small but lane/sublane-aligned sizes (H multiple of 128, B multiple of 8).
    vocab_size, emb_dim, hidden_dim, num_layers = 256, 128, 128, 2
    T, B = 8, 8

    key = jax.random.PRNGKey(0)
    kp, ki = jax.random.split(key)
    params = init_decoder_params(kp, vocab_size, emb_dim, hidden_dim, num_layers)
    input_idx = jax.random.randint(ki, (T, B), 0, vocab_size, dtype=jnp.int32)
    state = init_hidden(num_layers, B, hidden_dim)

    fwd = jax.jit(decoder_forward, static_argnames=("time_chunk",))
    # time_chunk=4 -> 2 grid steps, exercising the carried-state path.
    logits, (hT, cT) = fwd(params, input_idx, state, time_chunk=4)
    jax.block_until_ready((logits, hT, cT))

    ref_logits, (ref_h, ref_c) = decoder_forward_ref(params, input_idx, state)
    assert logits.shape == (T * B, vocab_size)
    assert hT.shape == (num_layers, B, hidden_dim)
    assert cT.shape == (num_layers, B, hidden_dim)
    assert jnp.max(jnp.abs(logits - ref_logits)) < 3e-2
    assert jnp.max(jnp.abs(hT - ref_h)) < 1e-2
    assert jnp.max(jnp.abs(cT - ref_c)) < 1e-2

    print("KERNEL_OK")
</pallas_src>

<mosaic_0001>
module attributes {stable_mosaic.version = 11 : i64} {
  func.func @_tied_proj_kernel(%arg0: i32, %arg1: i32, %arg2: memref<64x128xbf16, #tpu.memory_space<vmem>>, %arg3: memref<128x256xbf16, #tpu.memory_space<vmem>>, %arg4: memref<1x256xf32, #tpu.memory_space<vmem>>, %arg5: memref<64x256xf32, #tpu.memory_space<vmem>>) attributes {dimension_semantics = [#tpu.dimension_semantics<parallel>, #tpu.dimension_semantics<parallel>], iteration_bounds = array<i64: 1, 1>, scalar_prefetch = 0 : i64, scratch_operands = 0 : i64, tpu.core_type = #tpu.core_type<tc>, window_params = [{transform_indices = @transform_0, window_bounds = array<i64: 64, 128>}, {transform_indices = @transform_1, window_bounds = array<i64: 128, 256>}, {transform_indices = @transform_2, window_bounds = array<i64: 1, 256>}, {transform_indices = @transform_3, window_bounds = array<i64: 64, 256>}]} {
    %c0 = arith.constant 0 : index
    %c0_0 = arith.constant 0 : index
    %0 = vector.load %arg2[%c0, %c0_0] : memref<64x128xbf16, #tpu.memory_space<vmem>>, vector<64x128xbf16>
    %c0_1 = arith.constant 0 : index
    %c0_2 = arith.constant 0 : index
    %1 = vector.load %arg3[%c0_1, %c0_2] : memref<128x256xbf16, #tpu.memory_space<vmem>>, vector<128x256xbf16>
    %cst = arith.constant dense<0.000000e+00> : vector<64x256xf32>
    %2 = tpu.matmul %0, %1, %cst {dimension_numbers = #tpu.dot_dimension_numbers<[1], [0], [0], [1], [0, 0, 1, 1], [], []>} : vector<64x128xbf16>, vector<128x256xbf16>, vector<64x256xf32> -> vector<64x256xf32>
    %c0_3 = arith.constant 0 : index
    %c0_4 = arith.constant 0 : index
    %3 = vector.load %arg4[%c0_3, %c0_4] : memref<1x256xf32, #tpu.memory_space<vmem>>, vector<1x256xf32>
    %4 = vector.broadcast %3 : vector<1x256xf32> to vector<64x256xf32>
    %5 = arith.addf %2, %4 : vector<64x256xf32>
    %c0_5 = arith.constant 0 : index
    %c0_6 = arith.constant 0 : index
    %6 = vector.load %arg5[%c0_5, %c0_6] : memref<64x256xf32, #tpu.memory_space<vmem>>, vector<64x256xf32>
    tpu.vector_store %arg5[%c0_5, %c0_6], %5 {strides = array<i32>} : memref<64x256xf32, #tpu.memory_space<vmem>>, vector<64x256xf32>,
    return
  }
  func.func @transform_0(%arg0: i32, %arg1: i32) -> (i32, i32) {
    %c0_i32 = arith.constant 0 : i32
    %c0_i32_0 = arith.constant 0 : i32
    return %arg1, %c0_i32 : i32, i32
  }
  func.func @transform_1(%arg0: i32, %arg1: i32) -> (i32, i32) {
    %c0_i32 = arith.constant 0 : i32
    %c0_i32_0 = arith.constant 0 : i32
    return %c0_i32, %arg0 : i32, i32
  }
  func.func @transform_2(%arg0: i32, %arg1: i32) -> (i32, i32) {
    %c0_i32 = arith.constant 0 : i32
    %c0_i32_0 = arith.constant 0 : i32
    return %c0_i32, %arg0 : i32, i32
  }
  func.func @transform_3(%arg0: i32, %arg1: i32) -> (i32, i32) {
    %c0_i32 = arith.constant 0 : i32
    return %arg1, %arg0 : i32, i32
  }
}

module attributes {stable_mosaic.version = 11 : i64} {
  func.func @_lstm_stack_kernel(%arg0: i32, %arg1: memref<32x128xbf16, #tpu.memory_space<vmem>>, %arg2: memref<2x128x512xbf16, #tpu.memory_space<vmem>>, %arg3: memref<2x128x512xbf16, #tpu.memory_space<vmem>>, %arg4: memref<2x1x512xf32, #tpu.memory_space<vmem>>, %arg5: memref<2x8x128xf32, #tpu.memory_space<vmem>>, %arg6: memref<2x8x128xf32, #tpu.memory_space<vmem>>, %arg7: memref<32x128xbf16, #tpu.memory_space<vmem>>, %arg8: memref<2x8x128xf32, #tpu.memory_space<vmem>>, %arg9: memref<2x8x128xf32, #tpu.memory_space<vmem>>, %arg10: memref<32x512xf32, #tpu.memory_space<vmem>>, %arg11: memref<32x128xbf16, #tpu.memory_space<vmem>>) attributes {dimension_semantics = [#tpu.dimension_semantics<arbitrary>], iteration_bounds = array<i64: 2>, scalar_prefetch = 0 : i64, scratch_operands = 2 : i64, tpu.core_type = #tpu.core_type<tc>, window_params = [{transform_indices = @transform_0, window_bounds = array<i64: 32, 128>}, {pipeline_mode = #tpu.pipeline_mode<synchronous>, transform_indices = @transform_1, window_bounds = array<i64: 2, 128, 512>}, {pipeline_mode = #tpu.pipeline_mode<synchronous>, transform_indices = @transform_2, window_bounds = array<i64: 2, 128, 512>}, {pipeline_mode = #tpu.pipeline_mode<synchronous>, transform_indices = @transform_3, window_bounds = array<i64: 2, 1, 512>}, {pipeline_mode = #tpu.pipeline_mode<synchronous>, transform_indices = @transform_4, window_bounds = array<i64: 2, 8, 128>}, {pipeline_mode = #tpu.pipeline_mode<synchronous>, transform_indices = @transform_5, window_bounds = array<i64: 2, 8, 128>}, {transform_indices = @transform_6, window_bounds = array<i64: 32, 128>}, {pipeline_mode = #tpu.pipeline_mode<synchronous>, transform_indices = @transform_7, window_bounds = array<i64: 2, 8, 128>}, {pipeline_mode = #tpu.pipeline_mode<synchronous>, transform_indices = @transform_8, window_bounds = array<i64: 2, 8, 128>}]} {
    %c0_i32 = arith.constant 0 : i32
    %0 = arith.cmpi eq, %arg0, %c0_i32 : i32
    %1 = arith.extui %0 : i1 to i32
    %c0_i32_0 = arith.constant 0 : i32
    %2 = arith.cmpi ne, %1, %c0_i32_0 : i32
    scf.if %2 {
      %c0_111 = arith.constant 0 : index
      %c0_112 = arith.constant 0 : index
      %c0_113 = arith.constant 0 : index
      %325 = vector.load %arg5[%c0_111, %c0_112, %c0_113] : memref<2x8x128xf32, #tpu.memory_space<vmem>>, vector<2x8x128xf32>
      %c0_114 = arith.constant 0 : index
      %c0_115 = arith.constant 0 : index
      %c0_116 = arith.constant 0 : index
      %326 = vector.load %arg8[%c0_114, %c0_115, %c0_116] : memref<2x8x128xf32, #tpu.memory_space<vmem>>, vector<2x8x128xf32>
      tpu.vector_store %arg8[%c0_114, %c0_115, %c0_116], %325 {strides = array<i32>} : memref<2x8x128xf32, #tpu.memory_space<vmem>>, vector<2x8x128xf32>,
      %c0_117 = arith.constant 0 : index
      %c0_118 = arith.constant 0 : index
      %c0_119 = arith.constant 0 : index
      %327 = vector.load %arg6[%c0_117, %c0_118, %c0_119] : memref<2x8x128xf32, #tpu.memory_space<vmem>>, vector<2x8x128xf32>
      %c0_120 = arith.constant 0 : index
      %c0_121 = arith.constant 0 : index
      %c0_122 = arith.constant 0 : index
      %328 = vector.load %arg9[%c0_120, %c0_121, %c0_122] : memref<2x8x128xf32, #tpu.memory_space<vmem>>, vector<2x8x128xf32>
      tpu.vector_store %arg9[%c0_120, %c0_121, %c0_122], %327 {strides = array<i32>} : memref<2x8x128xf32, #tpu.memory_space<vmem>>, vector<2x8x128xf32>,
    } else {
    }
    %c0 = arith.constant 0 : index
    %c0_1 = arith.constant 0 : index
    %3 = vector.load %arg1[%c0, %c0_1] : memref<32x128xbf16, #tpu.memory_space<vmem>>, vector<32x128xbf16>
    %c0_2 = arith.constant 0 : index
    %c0_3 = arith.constant 0 : index
    %c0_4 = arith.constant 0 : index
    %4 = vector.load %arg2[%c0_2, %c0_3, %c0_4] : memref<2x128x512xbf16, #tpu.memory_space<vmem>>, vector<1x128x512xbf16>
    %5 = vector.shape_cast %4 : vector<1x128x512xbf16> to vector<128x512xbf16>
    %cst = arith.constant dense<0.000000e+00> : vector<32x512xf32>
    %6 = tpu.matmul %3, %5, %cst {dimension_numbers = #tpu.dot_dimension_numbers<[1], [0], [0], [1], [0, 0, 1, 1], [], []>} : vector<32x128xbf16>, vector<128x512xbf16>, vector<32x512xf32> -> vector<32x512xf32>
    %c0_5 = arith.constant 0 : index
    %c0_6 = arith.constant 0 : index
    %c0_7 = arith.constant 0 : index
    %7 = vector.load %arg4[%c0_5, %c0_6, %c0_7] : memref<2x1x512xf32, #tpu.memory_space<vmem>>, vector<1x1x512xf32>
    %8 = vector.shape_cast %7 : vector<1x1x512xf32> to vector<1x512xf32>
    %9 = vector.broadcast %8 : vector<1x512xf32> to vector<32x512xf32>
    %10 = arith.addf %6, %9 : vector<32x512xf32>
    %c0_8 = arith.constant 0 : index
    %c0_9 = arith.constant 0 : index
    %11 = vector.load %arg10[%c0_8, %c0_9] : memref<32x512xf32, #tpu.memory_space<vmem>>, vector<32x512xf32>
    tpu.vector_store %arg10[%c0_8, %c0_9], %10 {strides = array<i32>} : memref<32x512xf32, #tpu.memory_space<vmem>>, vector<32x512xf32>,
    %c0_10 = arith.constant 0 : index
    %c0_11 = arith.constant 0 : index
    %c0_12 = arith.constant 0 : index
    %12 = vector.load %arg3[%c0_10, %c0_11, %c0_12] : memref<2x128x512xbf16, #tpu.memory_space<vmem>>, vector<1x128x512xbf16>
    %13 = vector.shape_cast %12 : vector<1x128x512xbf16> to vector<128x512xbf16>
    %c0_13 = arith.constant 0 : index
    %c0_14 = arith.constant 0 : index
    %c0_15 = arith.constant 0 : index
    %14 = vector.load %arg8[%c0_13, %c0_14, %c0_15] : memref<2x8x128xf32, #tpu.memory_space<vmem>>, vector<1x8x128xf32>
    %15 = vector.shape_cast %14 : vector<1x8x128xf32> to vector<8x128xf32>
    %c0_16 = arith.constant 0 : index
    %c0_17 = arith.constant 0 : index
    %c0_18 = arith.constant 0 : index
    %16 = vector.load %arg9[%c0_16, %c0_17, %c0_18] : memref<2x8x128xf32, #tpu.memory_space<vmem>>, vector<1x8x128xf32>
    %17 = vector.shape_cast %16 : vector<1x8x128xf32> to vector<8x128xf32>
    %c0_i32_19 = arith.constant 0 : i32
    %c8_i32 = arith.constant 8 : i32
    %18 = arith.muli %c0_i32_19, %c8_i32 : i32
    %19 = tpu.assume_multiple %18, 8 : i32
    %20 = arith.index_cast %19 : i32 to index
    %c0_20 = arith.constant 0 : index
    %21 = vector.load %arg10[%20, %c0_20] : memref<32x512xf32, #tpu.memory_space<vmem>>, vector<8x512xf32>
    %22 = arith.truncf %15 : vector<8x128xf32> to vector<8x128xbf16>
    %cst_21 = arith.constant dense<0.000000e+00> : vector<8x512xf32>
    %23 = tpu.matmul %22, %13, %cst_21 {dimension_numbers = #tpu.dot_dimension_numbers<[1], [0], [0], [1], [0, 0, 1, 1], [], []>} : vector<8x128xbf16>, vector<128x512xbf16>, vector<8x512xf32> -> vector<8x512xf32>
    %24 = arith.addf %21, %23 : vector<8x512xf32>
    %25 = vector.extract_strided_slice %24 {offsets = [0, 0], sizes = [8, 128], strides = [1, 1]} : vector<8x512xf32> to vector<8x128xf32>
    %26 = arith.negf %25 : vector<8x128xf32>
    %27 = math.exp %26 : vector<8x128xf32>
    %cst_22 = arith.constant 1.000000e+00 : f32
    %28 = vector.broadcast %cst_22 : f32 to vector<8x128xf32>
    %29 = arith.addf %28, %27 : vector<8x128xf32>
    %30 = arith.divf %28, %29 : vector<8x128xf32>
    %31 = vector.extract_strided_slice %24 {offsets = [0, 128], sizes = [8, 128], strides = [1, 1]} : vector<8x512xf32> to vector<8x128xf32>
    %32 = arith.negf %31 : vector<8x128xf32>
    %33 = math.exp %32 : vector<8x128xf32>
    %cst_23 = arith.constant 1.000000e+00 : f32
    %34 = vector.broadcast %cst_23 : f32 to vector<8x128xf32>
    %35 = arith.addf %34, %33 : vector<8x128xf32>
    %36 = arith.divf %34, %35 : vector<8x128xf32>
    %37 = vector.extract_strided_slice %24 {offsets = [0, 256], sizes = [8, 128], strides = [1, 1]} : vector<8x512xf32> to vector<8x128xf32>
    %38 = math.tanh %37 : vector<8x128xf32>
    %39 = vector.extract_strided_slice %24 {offsets = [0, 384], sizes = [8, 128], strides = [1, 1]} : vector<8x512xf32> to vector<8x128xf32>
    %40 = arith.negf %39 : vector<8x128xf32>
    %41 = math.exp %40 : vector<8x128xf32>
    %cst_24 = arith.constant 1.000000e+00 : f32
    %42 = vector.broadcast %cst_24 : f32 to vector<8x128xf32>
    %43 = arith.addf %42, %41 : vector<8x128xf32>
    %44 = arith.divf %42, %43 : vector<8x128xf32>
    %45 = arith.mulf %36, %17 : vector<8x128xf32>
    %46 = arith.mulf %30, %38 : vector<8x128xf32>
    %47 = arith.addf %45, %46 : vector<8x128xf32>
    %48 = math.tanh %47 : vector<8x128xf32>
    %49 = arith.mulf %44, %48 : vector<8x128xf32>
    %50 = arith.truncf %49 : vector<8x128xf32> to vector<8x128xbf16>
    %51 = arith.index_cast %19 : i32 to index
    %c0_25 = arith.constant 0 : index
    %52 = vector.load %arg11[%51, %c0_25] : memref<32x128xbf16, #tpu.memory_space<vmem>>, vector<8x128xbf16>
    tpu.vector_store %arg11[%51, %c0_25], %50 {strides = array<i32>} : memref<32x128xbf16, #tpu.memory_space<vmem>>, vector<8x128xbf16>,
    %c1_i32 = arith.constant 1 : i32
    %c8_i32_26 = arith.constant 8 : i32
    %53 = arith.muli %c1_i32, %c8_i32_26 : i32
    %54 = tpu.assume_multiple %53, 8 : i32
    %55 = arith.index_cast %54 : i32 to index
    %c0_27 = arith.constant 0 : index
    %56 = vector.load %arg10[%55, %c0_27] : memref<32x512xf32, #tpu.memory_space<vmem>>, vector<8x512xf32>
    %57 = arith.truncf %49 : vector<8x128xf32> to vector<8x128xbf16>
    %cst_28 = arith.constant dense<0.000000e+00> : vector<8x512xf32>
    %58 = tpu.matmul %57, %13, %cst_28 {dimension_numbers = #tpu.dot_dimension_numbers<[1], [0], [0], [1], [0, 0, 1, 1], [], []>} : vector<8x128xbf16>, vector<128x512xbf16>, vector<8x512xf32> -> vector<8x512xf32>
    %59 = arith.addf %56, %58 : vector<8x512xf32>
    %60 = vector.extract_strided_slice %59 {offsets = [0, 0], sizes = [8, 128], strides = [1, 1]} : vector<8x512xf32> to vector<8x128xf32>
    %61 = arith.negf %60 : vector<8x128xf32>
    %62 = math.exp %61 : vector<8x128xf32>
    %cst_29 = arith.constant 1.000000e+00 : f32
    %63 = vector.broadcast %cst_29 : f32 to vector<8x128xf32>
    %64 = arith.addf %63, %62 : vector<8x128xf32>
    %65 = arith.divf %63, %64 : vector<8x128xf32>
    %66 = vector.extract_strided_slice %59 {offsets = [0, 128], sizes = [8, 128], strides = [1, 1]} : vector<8x512xf32> to vector<8x128xf32>
    %67 = arith.negf %66 : vector<8x128xf32>
    %68 = math.exp %67 : vector<8x128xf32>
    %cst_30 = arith.constant 1.000000e+00 : f32
    %69 = vector.broadcast %cst_30 : f32 to vector<8x128xf32>
    %70 = arith.addf %69, %68 : vector<8x128xf32>
    %71 = arith.divf %69, %70 : vector<8x128xf32>
    %72 = vector.extract_strided_slice %59 {offsets = [0, 256], sizes = [8, 128], strides = [1, 1]} : vector<8x512xf32> to vector<8x128xf32>
    %73 = math.tanh %72 : vector<8x128xf32>
    %74 = vector.extract_strided_slice %59 {offsets = [0, 384], sizes = [8, 128], strides = [1, 1]} : vector<8x512xf32> to vector<8x128xf32>
    %75 = arith.negf %74 : vector<8x128xf32>
    %76 = math.exp %75 : vector<8x128xf32>
    %cst_31 = arith.constant 1.000000e+00 : f32
    %77 = vector.broadcast %cst_31 : f32 to vector<8x128xf32>
    %78 = arith.addf %77, %76 : vector<8x128xf32>
    %79 = arith.divf %77, %78 : vector<8x128xf32>
    %80 = arith.mulf %71, %47 : vector<8x128xf32>
    %81 = arith.mulf %65, %73 : vector<8x128xf32>
    %82 = arith.addf %80, %81 : vector<8x128xf32>
    %83 = math.tanh %82 : vector<8x128xf32>
    %84 = arith.mulf %79, %83 : vector<8x128xf32>
    %85 = arith.truncf %84 : vector<8x128xf32> to vector<8x128xbf16>
    %86 = arith.index_cast %54 : i32 to index
    %c0_32 = arith.constant 0 : index
    %87 = vector.load %arg11[%86, %c0_32] : memref<32x128xbf16, #tpu.memory_space<vmem>>, vector<8x128xbf16>
    tpu.vector_store %arg11[%86, %c0_32], %85 {strides = array<i32>} : memref<32x128xbf16, #tpu.memory_space<vmem>>, vector<8x128xbf16>,
    %c2_i32 = arith.constant 2 : i32
    %c8_i32_33 = arith.constant 8 : i32
    %88 = arith.muli %c2_i32, %c8_i32_33 : i32
    %89 = tpu.assume_multiple %88, 8 : i32
    %90 = arith.index_cast %89 : i32 to index
    %c0_34 = arith.constant 0 : index
    %91 = vector.load %arg10[%90, %c0_34] : memref<32x512xf32, #tpu.memory_space<vmem>>, vector<8x512xf32>
    %92 = arith.truncf %84 : vector<8x128xf32> to vector<8x128xbf16>
    %cst_35 = arith.constant dense<0.000000e+00> : vector<8x512xf32>
    %93 = tpu.matmul %92, %13, %cst_35 {dimension_numbers = #tpu.dot_dimension_numbers<[1], [0], [0], [1], [0, 0, 1, 1], [], []>} : vector<8x128xbf16>, vector<128x512xbf16>, vector<8x512xf32> -> vector<8x512xf32>
    %94 = arith.addf %91, %93 : vector<8x512xf32>
    %95 = vector.extract_strided_slice %94 {offsets = [0, 0], sizes = [8, 128], strides = [1, 1]} : vector<8x512xf32> to vector<8x128xf32>
    %96 = arith.negf %95 : vector<8x128xf32>
    %97 = math.exp %96 : vector<8x128xf32>
    %cst_36 = arith.constant 1.000000e+00 : f32
    %98 = vector.broadcast %cst_36 : f32 to vector<8x128xf32>
    %99 = arith.addf %98, %97 : vector<8x128xf32>
    %100 = arith.divf %98, %99 : vector<8x128xf32>
    %101 = vector.extract_strided_slice %94 {offsets = [0, 128], sizes = [8, 128], strides = [1, 1]} : vector<8x512xf32> to vector<8x128xf32>
    %102 = arith.negf %101 : vector<8x128xf32>
    %103 = math.exp %102 : vector<8x128xf32>
    %cst_37 = arith.constant 1.000000e+00 : f32
    %104 = vector.broadcast %cst_37 : f32 to vector<8x128xf32>
    %105 = arith.addf %104, %103 : vector<8x128xf32>
    %106 = arith.divf %104, %105 : vector<8x128xf32>
    %107 = vector.extract_strided_slice %94 {offsets = [0, 256], sizes = [8, 128], strides = [1, 1]} : vector<8x512xf32> to vector<8x128xf32>
    %108 = math.tanh %107 : vector<8x128xf32>
    %109 = vector.extract_strided_slice %94 {offsets = [0, 384], sizes = [8, 128], strides = [1, 1]} : vector<8x512xf32> to vector<8x128xf32>
    %110 = arith.negf %109 : vector<8x128xf32>
    %111 = math.exp %110 : vector<8x128xf32>
    %cst_38 = arith.constant 1.000000e+00 : f32
    %112 = vector.broadcast %cst_38 : f32 to vector<8x128xf32>
    %113 = arith.addf %112, %111 : vector<8x128xf32>
    %114 = arith.divf %112, %113 : vector<8x128xf32>
    %115 = arith.mulf %106, %82 : vector<8x128xf32>
    %116 = arith.mulf %100, %108 : vector<8x128xf32>
    %117 = arith.addf %115, %116 : vector<8x128xf32>
    %118 = math.tanh %117 : vector<8x128xf32>
    %119 = arith.mulf %114, %118 : vector<8x128xf32>
    %120 = arith.truncf %119 : vector<8x128xf32> to vector<8x128xbf16>
    %121 = arith.index_cast %89 : i32 to index
    %c0_39 = arith.constant 0 : index
    %122 = vector.load %arg11[%121, %c0_39] : memref<32x128xbf16, #tpu.memory_space<vmem>>, vector<8x128xbf16>
    tpu.vector_store %arg11[%121, %c0_39], %120 {strides = array<i32>} : memref<32x128xbf16, #tpu.memory_space<vmem>>, vector<8x128xbf16>,
    %c3_i32 = arith.constant 3 : i32
    %c8_i32_40 = arith.constant 8 : i32
    %123 = arith.muli %c3_i32, %c8_i32_40 : i32
    %124 = tpu.assume_multiple %123, 8 : i32
    %125 = arith.index_cast %124 : i32 to index
    %c0_41 = arith.constant 0 : index
    %126 = vector.load %arg10[%125, %c0_41] : memref<32x512xf32, #tpu.memory_space<vmem>>, vector<8x512xf32>
    %127 = arith.truncf %119 : vector<8x128xf32> to vector<8x128xbf16>
    %cst_42 = arith.constant dense<0.000000e+00> : vector<8x512xf32>
    %128 = tpu.matmul %127, %13, %cst_42 {dimension_numbers = #tpu.dot_dimension_numbers<[1], [0], [0], [1], [0, 0, 1, 1], [], []>} : vector<8x128xbf16>, vector<128x512xbf16>, vector<8x512xf32> -> vector<8x512xf32>
    %129 = arith.addf %126, %128 : vector<8x512xf32>
    %130 = vector.extract_strided_slice %129 {offsets = [0, 0], sizes = [8, 128], strides = [1, 1]} : vector<8x512xf32> to vector<8x128xf32>
    %131 = arith.negf %130 : vector<8x128xf32>
    %132 = math.exp %131 : vector<8x128xf32>
    %cst_43 = arith.constant 1.000000e+00 : f32
    %133 = vector.broadcast %cst_43 : f32 to vector<8x128xf32>
    %134 = arith.addf %133, %132 : vector<8x128xf32>
    %135 = arith.divf %133, %134 : vector<8x128xf32>
    %136 = vector.extract_strided_slice %129 {offsets = [0, 128], sizes = [8, 128], strides = [1, 1]} : vector<8x512xf32> to vector<8x128xf32>
    %137 = arith.negf %136 : vector<8x128xf32>
    %138 = math.exp %137 : vector<8x128xf32>
    %cst_44 = arith.constant 1.000000e+00 : f32
    %139 = vector.broadcast %cst_44 : f32 to vector<8x128xf32>
    %140 = arith.addf %139, %138 : vector<8x128xf32>
    %141 = arith.divf %139, %140 : vector<8x128xf32>
    %142 = vector.extract_strided_slice %129 {offsets = [0, 256], sizes = [8, 128], strides = [1, 1]} : vector<8x512xf32> to vector<8x128xf32>
    %143 = math.tanh %142 : vector<8x128xf32>
    %144 = vector.extract_strided_slice %129 {offsets = [0, 384], sizes = [8, 128], strides = [1, 1]} : vector<8x512xf32> to vector<8x128xf32>
    %145 = arith.negf %144 : vector<8x128xf32>
    %146 = math.exp %145 : vector<8x128xf32>
    %cst_45 = arith.constant 1.000000e+00 : f32
    %147 = vector.broadcast %cst_45 : f32 to vector<8x128xf32>
    %148 = arith.addf %147, %146 : vector<8x128xf32>
    %149 = arith.divf %147, %148 : vector<8x128xf32>
    %150 = arith.mulf %141, %117 : vector<8x128xf32>
    %151 = arith.mulf %135, %143 : vector<8x128xf32>
    %152 = arith.addf %150, %151 : vector<8x128xf32>
    %153 = math.tanh %152 : vector<8x128xf32>
    %154 = arith.mulf %149, %153 : vector<8x128xf32>
    %155 = arith.truncf %154 : vector<8x128xf32> to vector<8x128xbf16>
    %156 = arith.index_cast %124 : i32 to index
    %c0_46 = arith.constant 0 : index
    %157 = vector.load %arg11[%156, %c0_46] : memref<32x128xbf16, #tpu.memory_space<vmem>>, vector<8x128xbf16>
    tpu.vector_store %arg11[%156, %c0_46], %155 {strides = array<i32>} : memref<32x128xbf16, #tpu.memory_space<vmem>>, vector<8x128xbf16>,
    %c4_i32 = arith.constant 4 : i32
    %c0_47 = arith.constant 0 : index
    %c0_48 = arith.constant 0 : index
    %c0_49 = arith.constant 0 : index
    %158 = vector.load %arg8[%c0_47, %c0_48, %c0_49] : memref<2x8x128xf32, #tpu.memory_space<vmem>>, vector<1x8x128xf32>
    %159 = vector.shape_cast %158 : vector<1x8x128xf32> to vector<8x128xf32>
    %160 = vector.shape_cast %154 : vector<8x128xf32> to vector<1x8x128xf32>
    tpu.vector_store %arg8[%c0_47, %c0_48, %c0_49], %160 {strides = array<i32>} : memref<2x8x128xf32, #tpu.memory_space<vmem>>, vector<1x8x128xf32>,
    %c0_50 = arith.constant 0 : index
    %c0_51 = arith.constant 0 : index
    %c0_52 = arith.constant 0 : index
    %161 = vector.load %arg9[%c0_50, %c0_51, %c0_52] : memref<2x8x128xf32, #tpu.memory_space<vmem>>, vector<1x8x128xf32>
    %162 = vector.shape_cast %161 : vector<1x8x128xf32> to vector<8x128xf32>
    %163 = vector.shape_cast %152 : vector<8x128xf32> to vector<1x8x128xf32>
    tpu.vector_store %arg9[%c0_50, %c0_51, %c0_52], %163 {strides = array<i32>} : memref<2x8x128xf32, #tpu.memory_space<vmem>>, vector<1x8x128xf32>,
    %c0_53 = arith.constant 0 : index
    %c0_54 = arith.constant 0 : index
    %164 = vector.load %arg11[%c0_53, %c0_54] : memref<32x128xbf16, #tpu.memory_space<vmem>>, vector<32x128xbf16>
    %c1 = arith.constant 1 : index
    %c0_55 = arith.constant 0 : index
    %c0_56 = arith.constant 0 : index
    %165 = vector.load %arg2[%c1, %c0_55, %c0_56] : memref<2x128x512xbf16, #tpu.memory_space<vmem>>, vector<1x128x512xbf16>
    %166 = vector.shape_cast %165 : vector<1x128x512xbf16> to vector<128x512xbf16>
    %cst_57 = arith.constant dense<0.000000e+00> : vector<32x512xf32>
    %167 = tpu.matmul %164, %166, %cst_57 {dimension_numbers = #tpu.dot_dimension_numbers<[1], [0], [0], [1], [0, 0, 1, 1], [], []>} : vector<32x128xbf16>, vector<128x512xbf16>, vector<32x512xf32> -> vector<32x512xf32>
    %c1_58 = arith.constant 1 : index
    %c0_59 = arith.constant 0 : index
    %c0_60 = arith.constant 0 : index
    %168 = vector.load %arg4[%c1_58, %c0_59, %c0_60] : memref<2x1x512xf32, #tpu.memory_space<vmem>>, vector<1x1x512xf32>
    %169 = vector.shape_cast %168 : vector<1x1x512xf32> to vector<1x512xf32>
    %170 = vector.broadcast %169 : vector<1x512xf32> to vector<32x512xf32>
    %171 = arith.addf %167, %170 : vector<32x512xf32>
    %c0_61 = arith.constant 0 : index
    %c0_62 = arith.constant 0 : index
    %172 = vector.load %arg10[%c0_61, %c0_62] : memref<32x512xf32, #tpu.memory_space<vmem>>, vector<32x512xf32>
    tpu.vector_store %arg10[%c0_61, %c0_62], %171 {strides = array<i32>} : memref<32x512xf32, #tpu.memory_space<vmem>>, vector<32x512xf32>,
    %c1_63 = arith.constant 1 : index
    %c0_64 = arith.constant 0 : index
    %c0_65 = arith.constant 0 : index
    %173 = vector.load %arg3[%c1_63, %c0_64, %c0_65] : memref<2x128x512xbf16, #tpu.memory_space<vmem>>, vector<1x128x512xbf16>
    %174 = vector.shape_cast %173 : vector<1x128x512xbf16> to vector<128x512xbf16>
    %c1_66 = arith.constant 1 : index
    %c0_67 = arith.constant 0 : index
    %c0_68 = arith.constant 0 : index
    %175 = vector.load %arg8[%c1_66, %c0_67, %c0_68] : memref<2x8x128xf32, #tpu.memory_space<vmem>>, vector<1x8x128xf32>
    %176 = vector.shape_cast %175 : vector<1x8x128xf32> to vector<8x128xf32>
    %c1_69 = arith.constant 1 : index
    %c0_70 = arith.constant 0 : index
    %c0_71 = arith.constant 0 : index
    %177 = vector.load %arg9[%c1_69, %c0_70, %c0_71] : memref<2x8x128xf32, #tpu.memory_space<vmem>>, vector<1x8x128xf32>
    %178 = vector.shape_cast %177 : vector<1x8x128xf32> to vector<8x128xf32>
    %c0_i32_72 = arith.constant 0 : i32
    %c8_i32_73 = arith.constant 8 : i32
    %179 = arith.muli %c0_i32_72, %c8_i32_73 : i32
    %180 = tpu.assume_multiple %179, 8 : i32
    %181 = arith.index_cast %180 : i32 to index
    %c0_74 = arith.constant 0 : index
    %182 = vector.load %arg10[%181, %c0_74] : memref<32x512xf32, #tpu.memory_space<vmem>>, vector<8x512xf32>
    %183 = arith.truncf %176 : vector<8x128xf32> to vector<8x128xbf16>
    %cst_75 = arith.constant dense<0.000000e+00> : vector<8x512xf32>
    %184 = tpu.matmul %183, %174, %cst_75 {dimension_numbers = #tpu.dot_dimension_numbers<[1], [0], [0], [1], [0, 0, 1, 1], [], []>} : vector<8x128xbf16>, vector<128x512xbf16>, vector<8x512xf32> -> vector<8x512xf32>
    %185 = arith.addf %182, %184 : vector<8x512xf32>
    %186 = vector.extract_strided_slice %185 {offsets = [0, 0], sizes = [8, 128], strides = [1, 1]} : vector<8x512xf32> to vector<8x128xf32>
    %187 = arith.negf %186 : vector<8x128xf32>
    %188 = math.exp %187 : vector<8x128xf32>
    %cst_76 = arith.constant 1.000000e+00 : f32
    %189 = vector.broadcast %cst_76 : f32 to vector<8x128xf32>
    %190 = arith.addf %189, %188 : vector<8x128xf32>
    %191 = arith.divf %189, %190 : vector<8x128xf32>
    %192 = vector.extract_strided_slice %185 {offsets = [0, 128], sizes = [8, 128], strides = [1, 1]} : vector<8x512xf32> to vector<8x128xf32>
    %193 = arith.negf %192 : vector<8x128xf32>
    %194 = math.exp %193 : vector<8x128xf32>
    %cst_77 = arith.constant 1.000000e+00 : f32
    %195 = vector.broadcast %cst_77 : f32 to vector<8x128xf32>
    %196 = arith.addf %195, %194 : vector<8x128xf32>
    %197 = arith.divf %195, %196 : vector<8x128xf32>
    %198 = vector.extract_strided_slice %185 {offsets = [0, 256], sizes = [8, 128], strides = [1, 1]} : vector<8x512xf32> to vector<8x128xf32>
    %199 = math.tanh %198 : vector<8x128xf32>
    %200 = vector.extract_strided_slice %185 {offsets = [0, 384], sizes = [8, 128], strides = [1, 1]} : vector<8x512xf32> to vector<8x128xf32>
    %201 = arith.negf %200 : vector<8x128xf32>
    %202 = math.exp %201 : vector<8x128xf32>
    %cst_78 = arith.constant 1.000000e+00 : f32
    %203 = vector.broadcast %cst_78 : f32 to vector<8x128xf32>
    %204 = arith.addf %203, %202 : vector<8x128xf32>
    %205 = arith.divf %203, %204 : vector<8x128xf32>
    %206 = arith.mulf %197, %178 : vector<8x128xf32>
    %207 = arith.mulf %191, %199 : vector<8x128xf32>
    %208 = arith.addf %206, %207 : vector<8x128xf32>
    %209 = math.tanh %208 : vector<8x128xf32>
    %210 = arith.mulf %205, %209 : vector<8x128xf32>
    %211 = arith.truncf %210 : vector<8x128xf32> to vector<8x128xbf16>
    %212 = arith.index_cast %180 : i32 to index
    %c0_79 = arith.constant 0 : index
    %213 = vector.load %arg7[%212, %c0_79] : memref<32x128xbf16, #tpu.memory_space<vmem>>, vector<8x128xbf16>
    tpu.vector_store %arg7[%212, %c0_79], %211 {strides = array<i32>} : memref<32x128xbf16, #tpu.memory_space<vmem>>, vector<8x128xbf16>,
    %c1_i32_80 = arith.constant 1 : i32
    %c8_i32_81 = arith.constant 8 : i32
    %214 = arith.muli %c1_i32_80, %c8_i32_81 : i32
    %215 = tpu.assume_multiple %214, 8 : i32
    %216 = arith.index_cast %215 : i32 to index
    %c0_82 = arith.constant 0 : index
    %217 = vector.load %arg10[%216, %c0_82] : memref<32x512xf32, #tpu.memory_space<vmem>>, vector<8x512xf32>
    %218 = arith.truncf %210 : vector<8x128xf32> to vector<8x128xbf16>
    %cst_83 = arith.constant dense<0.000000e+00> : vector<8x512xf32>
    %219 = tpu.matmul %218, %174, %cst_83 {dimension_numbers = #tpu.dot_dimension_numbers<[1], [0], [0], [1], [0, 0, 1, 1], [], []>} : vector<8x128xbf16>, vector<128x512xbf16>, vector<8x512xf32> -> vector<8x512xf32>
    %220 = arith.addf %217, %219 : vector<8x512xf32>
    %221 = vector.extract_strided_slice %220 {offsets = [0, 0], sizes = [8, 128], strides = [1, 1]} : vector<8x512xf32> to vector<8x128xf32>
    %222 = arith.negf %221 : vector<8x128xf32>
    %223 = math.exp %222 : vector<8x128xf32>
    %cst_84 = arith.constant 1.000000e+00 : f32
    %224 = vector.broadcast %cst_84 : f32 to vector<8x128xf32>
    %225 = arith.addf %224, %223 : vector<8x128xf32>
    %226 = arith.divf %224, %225 : vector<8x128xf32>
    %227 = vector.extract_strided_slice %220 {offsets = [0, 128], sizes = [8, 128], strides = [1, 1]} : vector<8x512xf32> to vector<8x128xf32>
    %228 = arith.negf %227 : vector<8x128xf32>
    %229 = math.exp %228 : vector<8x128xf32>
    %cst_85 = arith.constant 1.000000e+00 : f32
    %230 = vector.broadcast %cst_85 : f32 to vector<8x128xf32>
    %231 = arith.addf %230, %229 : vector<8x128xf32>
    %232 = arith.divf %230, %231 : vector<8x128xf32>
    %233 = vector.extract_strided_slice %220 {offsets = [0, 256], sizes = [8, 128], strides = [1, 1]} : vector<8x512xf32> to vector<8x128xf32>
    %234 = math.tanh %233 : vector<8x128xf32>
    %235 = vector.extract_strided_slice %220 {offsets = [0, 384], sizes = [8, 128], strides = [1, 1]} : vector<8x512xf32> to vector<8x128xf32>
    %236 = arith.negf %235 : vector<8x128xf32>
    %237 = math.exp %236 : vector<8x128xf32>
    %cst_86 = arith.constant 1.000000e+00 : f32
    %238 = vector.broadcast %cst_86 : f32 to vector<8x128xf32>
    %239 = arith.addf %238, %237 : vector<8x128xf32>
    %240 = arith.divf %238, %239 : vector<8x128xf32>
    %241 = arith.mulf %232, %208 : vector<8x128xf32>
    %242 = arith.mulf %226, %234 : vector<8x128xf32>
    %243 = arith.addf %241, %242 : vector<8x128xf32>
    %244 = math.tanh %243 : vector<8x128xf32>
    %245 = arith.mulf %240, %244 : vector<8x128xf32>
    %246 = arith.truncf %245 : vector<8x128xf32> to vector<8x128xbf16>
    %247 = arith.index_cast %215 : i32 to index
    %c0_87 = arith.constant 0 : index
    %248 = vector.load %arg7[%247, %c0_87] : memref<32x128xbf16, #tpu.memory_space<vmem>>, vector<8x128xbf16>
    tpu.vector_store %arg7[%247, %c0_87], %246 {strides = array<i32>} : memref<32x128xbf16, #tpu.memory_space<vmem>>, vector<8x128xbf16>,
    %c2_i32_88 = arith.constant 2 : i32
    %c8_i32_89 = arith.constant 8 : i32
    %249 = arith.muli %c2_i32_88, %c8_i32_89 : i32
    %250 = tpu.assume_multiple %249, 8 : i32
    %251 = arith.index_cast %250 : i32 to index
    %c0_90 = arith.constant 0 : index
    %252 = vector.load %arg10[%251, %c0_90] : memref<32x512xf32, #tpu.memory_space<vmem>>, vector<8x512xf32>
    %253 = arith.truncf %245 : vector<8x128xf32> to vector<8x128xbf16>
    %cst_91 = arith.constant dense<0.000000e+00> : vector<8x512xf32>
    %254 = tpu.matmul %253, %174, %cst_91 {dimension_numbers = #tpu.dot_dimension_numbers<[1], [0], [0], [1], [0, 0, 1, 1], [], []>} : vector<8x128xbf16>, vector<128x512xbf16>, vector<8x512xf32> -> vector<8x512xf32>
    %255 = arith.addf %252, %254 : vector<8x512xf32>
    %256 = vector.extract_strided_slice %255 {offsets = [0, 0], sizes = [8, 128], strides = [1, 1]} : vector<8x512xf32> to vector<8x128xf32>
    %257 = arith.negf %256 : vector<8x128xf32>
    %258 = math.exp %257 : vector<8x128xf32>
    %cst_92 = arith.constant 1.000000e+00 : f32
    %259 = vector.broadcast %cst_92 : f32 to vector<8x128xf32>
    %260 = arith.addf %259, %258 : vector<8x128xf32>
    %261 = arith.divf %259, %260 : vector<8x128xf32>
    %262 = vector.extract_strided_slice %255 {offsets = [0, 128], sizes = [8, 128], strides = [1, 1]} : vector<8x512xf32> to vector<8x128xf32>
    %263 = arith.negf %262 : vector<8x128xf32>
    %264 = math.exp %263 : vector<8x128xf32>
    %cst_93 = arith.constant 1.000000e+00 : f32
    %265 = vector.broadcast %cst_93 : f32 to vector<8x128xf32>
    %266 = arith.addf %265, %264 : vector<8x128xf32>
    %267 = arith.divf %265, %266 : vector<8x128xf32>
    %268 = vector.extract_strided_slice %255 {offsets = [0, 256], sizes = [8, 128], strides = [1, 1]} : vector<8x512xf32> to vector<8x128xf32>
    %269 = math.tanh %268 : vector<8x128xf32>
    %270 = vector.extract_strided_slice %255 {offsets = [0, 384], sizes = [8, 128], strides = [1, 1]} : vector<8x512xf32> to vector<8x128xf32>
    %271 = arith.negf %270 : vector<8x128xf32>
    %272 = math.exp %271 : vector<8x128xf32>
    %cst_94 = arith.constant 1.000000e+00 : f32
    %273 = vector.broadcast %cst_94 : f32 to vector<8x128xf32>
    %274 = arith.addf %273, %272 : vector<8x128xf32>
    %275 = arith.divf %273, %274 : vector<8x128xf32>
    %276 = arith.mulf %267, %243 : vector<8x128xf32>
    %277 = arith.mulf %261, %269 : vector<8x128xf32>
    %278 = arith.addf %276, %277 : vector<8x128xf32>
    %279 = math.tanh %278 : vector<8x128xf32>
    %280 = arith.mulf %275, %279 : vector<8x128xf32>
    %281 = arith.truncf %280 : vector<8x128xf32> to vector<8x128xbf16>
    %282 = arith.index_cast %250 : i32 to index
    %c0_95 = arith.constant 0 : index
    %283 = vector.load %arg7[%282, %c0_95] : memref<32x128xbf16, #tpu.memory_space<vmem>>, vector<8x128xbf16>
    tpu.vector_store %arg7[%282, %c0_95], %281 {strides = array<i32>} : memref<32x128xbf16, #tpu.memory_space<vmem>>, vector<8x128xbf16>,
    %c3_i32_96 = arith.constant 3 : i32
    %c8_i32_97 = arith.constant 8 : i32
    %284 = arith.muli %c3_i32_96, %c8_i32_97 : i32
    %285 = tpu.assume_multiple %284, 8 : i32
    %286 = arith.index_cast %285 : i32 to index
    %c0_98 = arith.constant 0 : index
    %287 = vector.load %arg10[%286, %c0_98] : memref<32x512xf32, #tpu.memory_space<vmem>>, vector<8x512xf32>
    %288 = arith.truncf %280 : vector<8x128xf32> to vector<8x128xbf16>
    %cst_99 = arith.constant dense<0.000000e+00> : vector<8x512xf32>
    %289 = tpu.matmul %288, %174, %cst_99 {dimension_numbers = #tpu.dot_dimension_numbers<[1], [0], [0], [1], [0, 0, 1, 1], [], []>} : vector<8x128xbf16>, vector<128x512xbf16>, vector<8x512xf32> -> vector<8x512xf32>
    %290 = arith.addf %287, %289 : vector<8x512xf32>
    %291 = vector.extract_strided_slice %290 {offsets = [0, 0], sizes = [8, 128], strides = [1, 1]} : vector<8x512xf32> to vector<8x128xf32>
    %292 = arith.negf %291 : vector<8x128xf32>
    %293 = math.exp %292 : vector<8x128xf32>
    %cst_100 = arith.constant 1.000000e+00 : f32
    %294 = vector.broadcast %cst_100 : f32 to vector<8x128xf32>
    %295 = arith.addf %294, %293 : vector<8x128xf32>
    %296 = arith.divf %294, %295 : vector<8x128xf32>
    %297 = vector.extract_strided_slice %290 {offsets = [0, 128], sizes = [8, 128], strides = [1, 1]} : vector<8x512xf32> to vector<8x128xf32>
    %298 = arith.negf %297 : vector<8x128xf32>
    %299 = math.exp %298 : vector<8x128xf32>
    %cst_101 = arith.constant 1.000000e+00 : f32
    %300 = vector.broadcast %cst_101 : f32 to vector<8x128xf32>
    %301 = arith.addf %300, %299 : vector<8x128xf32>
    %302 = arith.divf %300, %301 : vector<8x128xf32>
    %303 = vector.extract_strided_slice %290 {offsets = [0, 256], sizes = [8, 128], strides = [1, 1]} : vector<8x512xf32> to vector<8x128xf32>
    %304 = math.tanh %303 : vector<8x128xf32>
    %305 = vector.extract_strided_slice %290 {offsets = [0, 384], sizes = [8, 128], strides = [1, 1]} : vector<8x512xf32> to vector<8x128xf32>
    %306 = arith.negf %305 : vector<8x128xf32>
    %307 = math.exp %306 : vector<8x128xf32>
    %cst_102 = arith.constant 1.000000e+00 : f32
    %308 = vector.broadcast %cst_102 : f32 to vector<8x128xf32>
    %309 = arith.addf %308, %307 : vector<8x128xf32>
    %310 = arith.divf %308, %309 : vector<8x128xf32>
    %311 = arith.mulf %302, %278 : vector<8x128xf32>
    %312 = arith.mulf %296, %304 : vector<8x128xf32>
    %313 = arith.addf %311, %312 : vector<8x128xf32>
    %314 = math.tanh %313 : vector<8x128xf32>
    %315 = arith.mulf %310, %314 : vector<8x128xf32>
    %316 = arith.truncf %315 : vector<8x128xf32> to vector<8x128xbf16>
    %317 = arith.index_cast %285 : i32 to index
    %c0_103 = arith.constant 0 : index
    %318 = vector.load %arg7[%317, %c0_103] : memref<32x128xbf16, #tpu.memory_space<vmem>>, vector<8x128xbf16>
    tpu.vector_store %arg7[%317, %c0_103], %316 {strides = array<i32>} : memref<32x128xbf16, #tpu.memory_space<vmem>>, vector<8x128xbf16>,
    %c4_i32_104 = arith.constant 4 : i32
    %c1_105 = arith.constant 1 : index
    %c0_106 = arith.constant 0 : index
    %c0_107 = arith.constant 0 : index
    %319 = vector.load %arg8[%c1_105, %c0_106, %c0_107] : memref<2x8x128xf32, #tpu.memory_space<vmem>>, vector<1x8x128xf32>
    %320 = vector.shape_cast %319 : vector<1x8x128xf32> to vector<8x128xf32>
    %321 = vector.shape_cast %315 : vector<8x128xf32> to vector<1x8x128xf32>
    tpu.vector_store %arg8[%c1_105, %c0_106, %c0_107], %321 {strides = array<i32>} : memref<2x8x128xf32, #tpu.memory_space<vmem>>, vector<1x8x128xf32>,
    %c1_108 = arith.constant 1 : index
    %c0_109 = arith.constant 0 : index
    %c0_110 = arith.constant 0 : index
    %322 = vector.load %arg9[%c1_108, %c0_109, %c0_110] : memref<2x8x128xf32, #tpu.memory_space<vmem>>, vector<1x8x128xf32>
    %323 = vector.shape_cast %322 : vector<1x8x128xf32> to vector<8x128xf32>
    %324 = vector.shape_cast %313 : vector<8x128xf32> to vector<1x8x128xf32>
    tpu.vector_store %arg9[%c1_108, %c0_109, %c0_110], %324 {strides = array<i32>} : memref<2x8x128xf32, #tpu.memory_space<vmem>>, vector<1x8x128xf32>,
    return
  }
  func.func @transform_0(%arg0: i32) -> (i32, i32) {
    %c0_i32 = arith.constant 0 : i32
    %c0_i32_0 = arith.constant 0 : i32
    return %arg0, %c0_i32 : i32, i32
  }
  func.func @transform_1(%arg0: i32) -> (i32, i32, i32) {
    %c0_i32 = arith.constant 0 : i32
    %c0_i32_0 = arith.constant 0 : i32
    %c0_i32_1 = arith.constant 0 : i32
    %c0_i32_2 = arith.constant 0 : i32
    return %c0_i32, %c0_i32_0, %c0_i32_1 : i32, i32, i32
  }
  func.func @transform_2(%arg0: i32) -> (i32, i32, i32) {
    %c0_i32 = arith.constant 0 : i32
    %c0_i32_0 = arith.constant 0 : i32
    %c0_i32_1 = arith.constant 0 : i32
    %c0_i32_2 = arith.constant 0 : i32
    return %c0_i32, %c0_i32_0, %c0_i32_1 : i32, i32, i32
  }
  func.func @transform_3(%arg0: i32) -> (i32, i32, i32) {
    %c0_i32 = arith.constant 0 : i32
    %c0_i32_0 = arith.constant 0 : i32
    %c0_i32_1 = arith.constant 0 : i32
    %c0_i32_2 = arith.constant 0 : i32
    return %c0_i32, %c0_i32_0, %c0_i32_1 : i32, i32, i32
  }
  func.func @transform_4(%arg0: i32) -> (i32, i32, i32) {
    %c0_i32 = arith.constant 0 : i32
    %c0_i32_0 = arith.constant 0 : i32
    %c0_i32_1 = arith.constant 0 : i32
    %c0_i32_2 = arith.constant 0 : i32
    return %c0_i32, %c0_i32_0, %c0_i32_1 : i32, i32, i32
  }
  func.func @transform_5(%arg0: i32) -> (i32, i32, i32) {
    %c0_i32 = arith.constant 0 : i32
    %c0_i32_0 = arith.constant 0 : i32
    %c0_i32_1 = arith.constant 0 : i32
    %c0_i32_2 = arith.constant 0 : i32
    return %c0_i32, %c0_i32_0, %c0_i32_1 : i32, i32, i32
  }
  func.func @transform_6(%arg0: i32) -> (i32, i32) {
    %c0_i32 = arith.constant 0 : i32
    %c0_i32_0 = arith.constant 0 : i32
    return %arg0, %c0_i32 : i32, i32
  }
  func.func @transform_7(%arg0: i32) -> (i32, i32, i32) {
    %c0_i32 = arith.constant 0 : i32
    %c0_i32_0 = arith.constant 0 : i32
    %c0_i32_1 = arith.constant 0 : i32
    %c0_i32_2 = arith.constant 0 : i32
    return %c0_i32, %c0_i32_0, %c0_i32_1 : i32, i32, i32
  }
  func.func @transform_8(%arg0: i32) -> (i32, i32, i32) {
    %c0_i32 = arith.constant 0 : i32
    %c0_i32_0 = arith.constant 0 : i32
    %c0_i32_1 = arith.constant 0 : i32
    %c0_i32_2 = arith.constant 0 : i32
    return %c0_i32, %c0_i32_0, %c0_i32_1 : i32, i32, i32
  }
}

</mosaic_0001>

<bundles_post_ra>
// kernel: decoder_forward.3
= control target key start
LH: loop header
LB: loop body
LE: loop exit
PB: predicated region body
PF: predicated region fallthrough
CT: control target
= control target key end

     0   :  { %v351_v2 = vmov 0   ;;  %s441_s0 = inlined_call_operand.vmem [shape: bf16[64,128], index: 0, kind: input, shape index: {}]   ;;  %s442_s1 = inlined_call_operand.vmem [shape: bf16[128,256], index: 1, kind: input, shape index: {}]   ;;  %s443_s2 = inlined_call_operand.vmem [shape: f32[1,256], index: 2, kind: input, shape index: {}]   ;;  %s444_s3 = inlined_call_operand.hbm [shape: f32[64,256], index: 3, kind: output, shape index: {}]  }
   0x1   :  { %v301_v0 = vld [vmem:[%s442_s1 + $0x74] ss:$8 sps:$4 sm:$0xff]   ;;  %v303_v1 = vld [vmem:[%s442_s1 + $0x70] ss:$8 sps:$4 sm:$0xff]   ;;  %188 = vmatprep.mubr.bf16.mxu0 %v351_v2  ;;  %208 = vmatprep.mubr.bf16.mxu1 %v351_v2  ;;  %v304_v3 = vld [vmem:[%s442_s1 + $0x64] ss:$8 sps:$4 sm:$0xff]  }
   0x2   :  { %156 = vmatprep.subr.bf16.mxu0 %v301_v0  ;;  %281 = vmatprep.subr.bf16.mxu1 %v301_v0  ;;  %v306_v4 = vld [vmem:[%s442_s1 + $0x60] ss:$8 sps:$4 sm:$0xff]   ;;  %v307_v5 = vld [vmem:[%s442_s1 + $0x54] ss:$8 sps:$4 sm:$0xff]   ;;  %v309_v6 = vld [vmem:[%s442_s1 + $0x50] ss:$8 sps:$4 sm:$0xff]  }
   0x3   :  { %157 = vmatpush1.bf16.msra.mxu0 %v303_v1  ;;  %289 = vmatpush1.bf16.msra.mxu1 %v303_v1  ;;  %v310_v7 = vld [vmem:[%s442_s1 + $0x44] ss:$8 sps:$4 sm:$0xff]   ;;  %v312_v8 = vld [vmem:[%s442_s1 + $0x40] ss:$8 sps:$4 sm:$0xff]   ;;  %v313_v9 = vld [vmem:[%s442_s1 + $0x34] ss:$8 sps:$4 sm:$0xff]  }
   0x4   :  { %158 = vmatprep.subr.bf16.mxu0 %v304_v3  ;;  %282 = vmatprep.subr.bf16.mxu1 %v304_v3  ;;  %v315_v10 = vld [vmem:[%s442_s1 + $0x30] ss:$8 sps:$4 sm:$0xff]  }
   0x7   :  { %159 = vmatpush1.bf16.msra.mxu0 %v306_v4  ;;  %290 = vmatpush1.bf16.msra.mxu1 %v306_v4 }
   0x8   :  { %160 = vmatprep.subr.bf16.mxu0 %v307_v5  ;;  %283 = vmatprep.subr.bf16.mxu1 %v307_v5 }
   0xb   :  { %161 = vmatpush1.bf16.msra.mxu0 %v309_v6  ;;  %291 = vmatpush1.bf16.msra.mxu1 %v309_v6 }
   0xc   :  { %162 = vmatprep.subr.bf16.mxu0 %v310_v7  ;;  %284 = vmatprep.subr.bf16.mxu1 %v310_v7 }
   0xf   :  { %163 = vmatpush1.bf16.msra.mxu0 %v312_v8  ;;  %292 = vmatpush1.bf16.msra.mxu1 %v312_v8 }
  0x10   :  { %8 = vsyncpa [#allocation3], 0  ;;  %164 = vmatprep.subr.bf16.mxu0 %v313_v9  ;;  %285 = vmatprep.subr.bf16.mxu1 %v313_v9  ;;  %v316_v11 = vld [vmem:[%s442_s1 + $0x24] ss:$8 sps:$4 sm:$0xff]   ;;  %v318_v12 = vld [vmem:[%s442_s1 + $0x20] ss:$8 sps:$4 sm:$0xff]   ;;  %v42_v21 = vlaneseq }
  0x11   :  { %v319_v13 = vld [vmem:[%s442_s1 + $0x14] ss:$8 sps:$4 sm:$0xff]   ;;  %v321_v14 = vld [vmem:[%s442_s1 + $0x10] ss:$8 sps:$4 sm:$0xff]   ;;  %v322_v15 = vld [vmem:[%s442_s1 + $0x4] ss:$8 sps:$4 sm:$0xff]  }
  0x12   :  { %v324_v16 = vld [vmem:[%s442_s1] ss:$8 sps:$4 sm:$0xff]   ;;  %v326_v18 = vld [vmem:[%s441_s0 + $0x10] sm:$0xff]   ;;  %v328_v20 = vld [vmem:[%s441_s0 + $0x18] sm:$0xff]   ;;  %v43_v22 = vshrl.u32 %v42_v21, 7 }
  0x13   :  { %165 = vmatpush1.bf16.msra.mxu0 %v315_v10  ;;  %293 = vmatpush1.bf16.msra.mxu1 %v315_v10  ;;  %v325_v17 = vld [vmem:[%s441_s0] sm:$0xff]   ;;  %v327_v19 = vld [vmem:[%s441_s0 + $0x8] sm:$0xff]   ;;  %s352_s0 = smov [#allocation2]  }
  0x14   :  { %166 = vmatprep.subr.bf16.mxu0 %v316_v11  ;;  %286 = vmatprep.subr.bf16.mxu1 %v316_v11  ;;  %v44_v23 = vsub.s32 0, %v43_v22  ;;  %v40_v24 = vld [vmem:[%s443_s2] sm:$0x3]  ;;  %v48_v25 = vsub.s32 1, %v43_v22  ;;  %s250_s2 = sshll.u32 %s352_s0, 4  ;;  %s251_s2 = int_to_ptr.vmem [resolvable:$true] %s250_s2 }
  0x15   :  { %s329_s26 = scalar_lea.vmem %s251_s2, 2048  ;;  %p334_p1 = scmp.lt.s32.totalorder %s251_s2, %s251_s2 }
  0x16   :  { %v45_v26 = vrot.slane %v40_v24, %v44_v23  ;;  %v49_v27 = vrot.slane %v40_v24, %v48_v25  ;;  %p330_p0 = scmp.ne.s32.totalorder %s251_s2, %s329_s26  ;;  %p335_p2 = scmp.lt.s32.totalorder %s329_s26, %s329_s26 }
  0x17   :  { %167 = vmatpush1.bf16.msra.mxu0 %v318_v12  ;;  %294 = vmatpush1.bf16.msra.mxu1 %v318_v12 }
  0x18   :  { %168 = vmatprep.subr.bf16.mxu0 %v319_v13  ;;  %287 = vmatprep.subr.bf16.mxu1 %v319_v13  ;;  %p336_p3 = por %p335_p2, %p334_p1 }
  0x1a   :  { %p337_p4 = pnand %p336_p3, %p330_p0 }
  0x1b   :  { %169 = vmatpush1.bf16.msra.mxu0 %v321_v14  ;;  %295 = vmatpush1.bf16.msra.mxu1 %v321_v14 }
  0x1c   :  { %170 = vmatprep.subr.bf16.mxu0 %v322_v15  ;;  %288 = vmatprep.subr.bf16.mxu1 %v322_v15 }
  0x1f   :  { %171 = vmatpush1.bf16.msra.mxu0 %v324_v16  ;;  %296 = vmatpush1.bf16.msra.mxu1 %v324_v16 }
  0x22   :  { %189 = vmatmul.mubr.bf16.vlgmr.msra.gmra.mxu0 %v325_v17  ;;  %209 = vmatmul.mubr.bf16.vlgmr.msra.gmra.mxu1 %v326_v18 }
  0x23   :  { %198 = vmatprep.mubr.bf16.mxu0 %v351_v2  ;;  %218 = vmatprep.mubr.bf16.mxu1 %v351_v2 }
  0x2a   :  { %199 = vmatmul.mubr.bf16.gmra.mxu0 %v327_v19  ;;  %219 = vmatmul.mubr.bf16.gmra.mxu1 %v328_v20 }
  0xe2   :  { %v190_v28 = vpop.f32.mrf.mxu0  ;;  %v210_v29 = vpop.f32.mrf.mxu1 }
  0xe3   :  { %v191_v30 = vadd.f32 %v190_v28, %v45_v26  ;;  %v211_v31 = vadd.f32 %v210_v29, %v45_v26 }
  0xe4   :  { %v192_v32 = vpop.f32.mrf.mxu0  ;;  %v212_v33 = vpop.f32.mrf.mxu1 }
  0xe5   :  { %229 = vst [vmem:[#allocation2] sm:$0xff] %v191_v30  ;;  %237 = vst [vmem:[#allocation2 + $0x40] sm:$0xff] %v211_v31  ;;  %v193_v34 = vadd.f32 %v192_v32, %v49_v27  ;;  %v213_v35 = vadd.f32 %v212_v33, %v49_v27 }
  0xe6   :  { %v194_v36 = vpop.f32.mrf.mxu0  ;;  %v214_v37 = vpop.f32.mrf.mxu1 }
  0xe7   :  { %230 = vst [vmem:[#allocation2 + $0x8] sm:$0xff] %v193_v34  ;;  %238 = vst [vmem:[#allocation2 + $0x48] sm:$0xff] %v213_v35  ;;  %v195_v38 = vadd.f32 %v194_v36, %v45_v26  ;;  %v215_v39 = vadd.f32 %v214_v37, %v45_v26 }
  0xe8   :  { %v196_v40 = vpop.f32.mrf.mxu0  ;;  %v216_v41 = vpop.f32.mrf.mxu1 }
  0xe9   :  { %231 = vst [vmem:[#allocation2 + $0x10] sm:$0xff] %v195_v38  ;;  %239 = vst [vmem:[#allocation2 + $0x50] sm:$0xff] %v215_v39  ;;  %v197_v42 = vadd.f32 %v196_v40, %v49_v27  ;;  %v217_v43 = vadd.f32 %v216_v41, %v49_v27 }
  0xea   :  { %v200_v44 = vpop.f32.mrf.mxu0  ;;  %v220_v45 = vpop.f32.mrf.mxu1 }
  0xeb   :  { %232 = vst [vmem:[#allocation2 + $0x18] sm:$0xff] %v197_v42  ;;  %240 = vst [vmem:[#allocation2 + $0x58] sm:$0xff] %v217_v43  ;;  %v201_v46 = vadd.f32 %v200_v44, %v45_v26  ;;  %v221_v47 = vadd.f32 %v220_v45, %v45_v26 }
  0xec   :  { %v202_v48 = vpop.f32.mrf.mxu0  ;;  %v222_v49 = vpop.f32.mrf.mxu1 }
  0xed   :  { %233 = vst [vmem:[#allocation2 + $0x20] sm:$0xff] %v201_v46  ;;  %241 = vst [vmem:[#allocation2 + $0x60] sm:$0xff] %v221_v47  ;;  %v203_v50 = vadd.f32 %v202_v48, %v49_v27  ;;  %v223_v51 = vadd.f32 %v222_v49, %v49_v27 }
  0xee   :  { %v204_v52 = vpop.f32.mrf.mxu0  ;;  %v224_v53 = vpop.f32.mrf.mxu1 }
  0xef   :  { %234 = vst [vmem:[#allocation2 + $0x28] sm:$0xff] %v203_v50  ;;  %242 = vst [vmem:[#allocation2 + $0x68] sm:$0xff] %v223_v51  ;;  %v205_v54 = vadd.f32 %v204_v52, %v45_v26  ;;  %v225_v55 = vadd.f32 %v224_v53, %v45_v26 }
  0xf0   :  { %v206_v56 = vpop.f32.mrf.mxu0  ;;  %v226_v57 = vpop.f32.mrf.mxu1 }
  0xf1   :  { %235 = vst [vmem:[#allocation2 + $0x30] sm:$0xff] %v205_v54  ;;  %243 = vst [vmem:[#allocation2 + $0x70] sm:$0xff] %v225_v55  ;;  %v207_v58 = vadd.f32 %v206_v56, %v49_v27  ;;  %v227_v59 = vadd.f32 %v226_v57, %v49_v27 }
  0xf3   :  { %236 = vst [vmem:[#allocation2 + $0x38] sm:$0xff] %v207_v58  ;;  %244 = vst [vmem:[#allocation2 + $0x78] sm:$0xff] %v227_v59 }
  0xf4   :  { %340 = shalt.err (!%p337_p4)
}
  0xf5   :  { %s353_s27 = smov 256   ;;  %s354_s28 = smov 16  }
  0xf6   :  { %256 = dma.vmem_to_hbm [thread:$0]  %s251_s2, 2048, %s444_s3, [#allocation3], %s353_s27, %s353_s27, %s354_s28  }
  0xf7   :  { %349 = dma.done.wait [#allocation3], 2048  }
  0xf8   :  { %350 = vsyncadd [#allocation3], 4294965248 }
  0xf9   :  { %260 = vsyncpa [#allocation3], 1 }

// kernel: decoder_forward.2
= control target key start
LH: loop header
LB: loop body
LE: loop exit
PB: predicated region body
PF: predicated region fallthrough
CT: control target
= control target key end

     0   :  { %14 = vsyncpa [#allocation5], 0  ;;  %s3920_s0 = inlined_call_operand.vmem [shape: bf16[64,128], index: 0, kind: input, shape index: {}]   ;;  %s3921_s1 = inlined_call_operand.hbm [shape: bf16[2,128,512], index: 1, kind: input, shape index: {}]   ;;  %s3922_s2 = inlined_call_operand.hbm [shape: bf16[2,128,512], index: 2, kind: input, shape index: {}]   ;;  %s3923_s3 = inlined_call_operand.vmem [shape: f32[2,1,512], index: 3, kind: input, shape index: {}]   ;;  %s3924_s4 = inlined_call_operand.vmem [shape: f32[2,8,128], index: 4, kind: input, shape index: {}]   ;;  %s3925_s5 = inlined_call_operand.vmem [shape: f32[2,8,128], index: 5, kind: input, shape index: {}]   ;;  %s3926_s6 = inlined_call_operand.vmem [shape: bf16[64,128], index: 6, kind: output, shape index: {0}]   ;;  %s3927_s7 = inlined_call_operand.hbm [shape: f32[2,8,128], index: 7, kind: output, shape index: {1}]   ;;  %s3928_s8 = inlined_call_operand.hbm [shape: f32[2,8,128], index: 8, kind: output, shape index: {2}]  }
   0x1   :  { %15 = vsyncpa [#allocation8], 0 }
   0x2   :  { %16 = vsyncpa [#allocation6], 0 }
   0x3   :  { %17 = vsyncpa [#allocation11], 0  ;;  %s3259_s27 = smov 0  }
   0x4 LB: > { %s3265_s28 = sadd.s32 4294967295, %s3203_s27   ;;  %p2531_p0 = scmp.ge.s32.totalorder %s3203_s27, 1  ;;  %s3203_s27 = sphi %s3259_s27, %s23_s27  }
   0x5   : > { %p227_p1 = scmp.lt.s32.totalorder %s3203_s27, 3  ;;  %s3205_s29 = smov [#allocation4]  }
   0x6   : > { %s239_s30 = sshll.u32 %s3205_s29, 4  ;;  %p2732_p4 = scmp.eq.s32.totalorder %s3265_s28, 0  ;;  %s240_s30 = int_to_ptr.vmem [resolvable:$true] %s239_s30 }
   0x7   : > { %p3270_p3 = pnand %p2531_p0, %p227_p1  ;;  %s3206_s10 = smov [#allocation7]  }
   0x8   : > { %s252_s11 = sshll.u32 %s3206_s10, 4  ;;  %s3092_s13 = scalar_lea.vmem %s240_s30, 8192  ;;  %s253_s11 = int_to_ptr.vmem [resolvable:$true] %s252_s11 }
   0x9   : > { %p2725_p5 = pneg %p3270_p3  ;;  %p3093_p8 = scmp.ne.s32.totalorder %s240_s30, %s3092_s13 }
   0xa   : > { %p3100_p11 = scmp.lt.s32.totalorder %s240_s30, %s240_s30  ;;  %p3101_p12 = scmp.lt.s32.totalorder %s3092_s13, %s3092_s13 }
   0xb   : > { %p3279_p6 = pnand %p2732_p4, %p2725_p5 }
   0xc   : > { %p3102_p13 = por %p3101_p12, %p3100_p11 }
   0xd   : > { %p3083_p7 = pneg %p3279_p6 }
   0xf   : > { %p3095_p9 = pnand %p3093_p8, %p3083_p7 }
  0x11   : > { %p3096_p10 = pneg %p3095_p9 }
  0x13   : > { %p3103_p0 = pnand %p3102_p13, %p3096_p10 }
  0x15   : > { %3106 = shalt.err (!%p3103_p0)
}
  0x16   : > { %s3207_s14 = smov 256   ;;  %s3208_s15 = smov 16  }
  0x17   : > { %2728 = dma.hbm_to_vmem [thread:$0]  (!%p3279_p6), %s3921_s1, 8192, %s240_s30, [#allocation5], %s3207_s14, %s3207_s14, %s3208_s15  }
  0x18   : > { %s3118_s18 = scalar_lea.vmem %s253_s11, 8192  ;;  %p3126_p9 = scmp.lt.s32.totalorder %s253_s11, %s253_s11 }
  0x19   : > { %p3119_p1 = scmp.ne.s32.totalorder %s253_s11, %s3118_s18  ;;  %p3127_p2 = scmp.lt.s32.totalorder %s3118_s18, %s3118_s18 }
  0x1b   : > { %p3121_p5 = pnand %p3119_p1, %p3083_p7  ;;  %p3128_p11 = por %p3127_p2, %p3126_p9 }
  0x1d   : > { %p3122_p8 = pneg %p3121_p5 }
  0x1f   : > { %p3129_p10 = pnand %p3128_p11, %p3122_p8 }
  0x21   : > { %3132 = shalt.err (!%p3129_p10)
}
  0x22   : > { %2731 = dma.hbm_to_vmem [thread:$0]  (!%p3279_p6), %s3922_s2, 8192, %s253_s11, [#allocation8], %s3207_s14, %s3207_s14, %s3208_s15  }
  0x23   : > { %286 = sbr.rel (%p3270_p3) target bundleno = 2149 (0x865), region = 44 }
  0x28   : > { %3186 = dma.done.wait (%p2732_p4), [#allocation5], 8192  }
  0x29   : > { %3188 = vsyncadd (%p2732_p4), [#allocation5], 4294959104 }
  0x2a   : > { %3190 = dma.done.wait (%p2732_p4), [#allocation8], 8192  }
  0x2b   : > { %3192 = vsyncadd (%p2732_p4), [#allocation8], 4294959104  ;;  %s2538_s21 = sshll.u32 %s3265_s28, 2  ;;  %p3939_p3 = scmp.ne.s32.totalorder %s3265_s28, 0 }
  0x2c   : > { %p325_p2 = scmp.lt.s32.totalorder %s2538_s21, 7 }
  0x2d   : > { %340 = sbr.rel (%p3939_p3) target bundleno = 53 (0x35), region = 56 }
  0x2e   : > { %s3972_s21 = smov (!%p325_p2, %s2538_s21), 7 }
  0x2f   : > { %s2539_s22 = sshll.u32 %s3972_s21, 2 }
  0x30   : > { %s3315_s25 = scalar_lea.vmem %s3920_s0, %s2539_s22  ;;  %s3320_s30 = scalar_lea.vmem %s3926_s6, %s2539_s22 }
  0x32   : > { %v341_v0 = vld [vmem:[%s3924_s4] sm:$0xff]  ;;  %v342_v1 = vld [vmem:[%s3924_s4 + $0x8] sm:$0xff] }
  0x33   : > { %v345_v2 = vld [vmem:[%s3925_s5] sm:$0xff]  ;;  %343 = vst [vmem:[#allocation9] sm:$0xff] %v341_v0  ;;  %344 = vst [vmem:[#allocation9 + $0x8] sm:$0xff] %v342_v1  ;;  %v346_v3 = vld [vmem:[%s3925_s5 + $0x8] sm:$0xff] }
  0x34   : > { %347 = vst [vmem:[#allocation10] sm:$0xff] %v345_v2  ;;  %348 = vst [vmem:[#allocation10 + $0x8] sm:$0xff] %v346_v3 }
  0x35 PF: > { %v2757_v4 = vld [vmem:[#allocation4 + $0xe4] ss:$16 sps:$4 sm:$0xff]   ;;  %v2759_v5 = vld [vmem:[#allocation4 + $0xec] ss:$16 sps:$4 sm:$0xff]   ;;  %v3933_v6 = vmov 0   ;;  %s3210_s21 = smov [#allocation10]  }
  0x36   : > { %611 = vmatprep.mubr.bf16.mxu0 %v3933_v6  ;;  %664 = vmatprep.mubr.bf16.mxu1 %v3933_v6  ;;  %v2761_v7 = vld [vmem:[#allocation4 + $0xe0] ss:$16 sps:$4 sm:$0xff]   ;;  %v2762_v8 = vld [vmem:[#allocation4 + $0xe8] ss:$16 sps:$4 sm:$0xff]   ;;  %v2763_v9 = vld [vmem:[#allocation4 + $0xc4] ss:$16 sps:$4 sm:$0xff]  }
  0x37   : > { %579 = vmatprep.subr.bf16.mxu0 %v2757_v4  ;;  %632 = vmatprep.subr.bf16.mxu1 %v2759_v5  ;;  %v2765_v10 = vld [vmem:[#allocation4 + $0xcc] ss:$16 sps:$4 sm:$0xff]   ;;  %v2767_v11 = vld [vmem:[#allocation4 + $0xc0] ss:$16 sps:$4 sm:$0xff]   ;;  %v2768_v12 = vld [vmem:[#allocation4 + $0xc8] ss:$16 sps:$4 sm:$0xff]  }
  0x38   : > { %580 = vmatpush1.bf16.msra.mxu0 %v2761_v7  ;;  %633 = vmatpush1.bf16.msra.mxu1 %v2762_v8  ;;  %v2769_v13 = vld [vmem:[#allocation4 + $0xa4] ss:$16 sps:$4 sm:$0xff]   ;;  %v2771_v14 = vld [vmem:[#allocation4 + $0xac] ss:$16 sps:$4 sm:$0xff]   ;;  %v2773_v15 = vld [vmem:[#allocation4 + $0xa0] ss:$16 sps:$4 sm:$0xff]  }
  0x39   : > { %581 = vmatprep.subr.bf16.mxu0 %v2763_v9  ;;  %634 = vmatprep.subr.bf16.mxu1 %v2765_v10  ;;  %v2774_v16 = vld [vmem:[#allocation4 + $0xa8] ss:$16 sps:$4 sm:$0xff]   ;;  %v2775_v17 = vld [vmem:[#allocation4 + $0x84] ss:$16 sps:$4 sm:$0xff]   ;;  %v2777_v18 = vld [vmem:[#allocation4 + $0x8c] ss:$16 sps:$4 sm:$0xff]   ;;  %v387_v10 = vlaneseq }
  0x3a   : > { %v2779_v19 = vld [vmem:[#allocation4 + $0x80] ss:$16 sps:$4 sm:$0xff]   ;;  %v2780_v20 = vld [vmem:[#allocation4 + $0x88] ss:$16 sps:$4 sm:$0xff]   ;;  %v2781_v21 = vld [vmem:[#allocation4 + $0x64] ss:$16 sps:$4 sm:$0xff]  }
  0x3b   : > { %v2783_v22 = vld [vmem:[#allocation4 + $0x6c] ss:$16 sps:$4 sm:$0xff]   ;;  %v2785_v23 = vld [vmem:[#allocation4 + $0x60] ss:$16 sps:$4 sm:$0xff]   ;;  %v2786_v24 = vld [vmem:[#allocation4 + $0x68] ss:$16 sps:$4 sm:$0xff]  }
  0x3c   : > { %582 = vmatpush1.bf16.msra.mxu0 %v2767_v11  ;;  %635 = vmatpush1.bf16.msra.mxu1 %v2768_v12  ;;  %v2787_v25 = vld [vmem:[#allocation4 + $0x44] ss:$16 sps:$4 sm:$0xff]   ;;  %v2789_v26 = vld [vmem:[#allocation4 + $0x4c] ss:$16 sps:$4 sm:$0xff]   ;;  %v2791_v27 = vld [vmem:[#allocation4 + $0x40] ss:$16 sps:$4 sm:$0xff]  }
  0x3d   : > { %583 = vmatprep.subr.bf16.mxu0 %v2769_v13  ;;  %636 = vmatprep.subr.bf16.mxu1 %v2771_v14  ;;  %v2792_v28 = vld [vmem:[#allocation4 + $0x48] ss:$16 sps:$4 sm:$0xff]   ;;  %v2793_v29 = vld [vmem:[#allocation4 + $0x24] ss:$16 sps:$4 sm:$0xff]   ;;  %v2795_v30 = vld [vmem:[#allocation4 + $0x2c] ss:$16 sps:$4 sm:$0xff]  }
  0x3e   : > { %v2797_v31 = vld [vmem:[#allocation4 + $0x20] ss:$16 sps:$4 sm:$0xff]   ;;  %v2798_v32 = vld [vmem:[#allocation4 + $0x28] ss:$16 sps:$4 sm:$0xff]   ;;  %v2799_v33 = vld [vmem:[#allocation4 + $0x4] ss:$16 sps:$4 sm:$0xff]  }
  0x3f   : > { %v2801_v34 = vld [vmem:[#allocation4 + $0xc] ss:$16 sps:$4 sm:$0xff]   ;;  %v2803_v35 = vld [vmem:[#allocation4] ss:$16 sps:$4 sm:$0xff]   ;;  %v2804_v36 = vld [vmem:[#allocation4 + $0x8] ss:$16 sps:$4 sm:$0xff]  }
  0x40   : > { %584 = vmatpush1.bf16.msra.mxu0 %v2773_v15  ;;  %637 = vmatpush1.bf16.msra.mxu1 %v2774_v16  ;;  %v3338_v37 = vld [vmem:[#allocation7 + $0xe4] ss:$16 sps:$4 sm:$0xff]   ;;  %v3340_v38 = vld [vmem:[#allocation7 + $0xec] ss:$16 sps:$4 sm:$0xff]   ;;  %v3343_v40 = vld [vmem:[#allocation7 + $0xe0] ss:$16 sps:$4 sm:$0xff]  }
  0x41   : > { %585 = vmatprep.subr.bf16.mxu0 %v2775_v17  ;;  %638 = vmatprep.subr.bf16.mxu1 %v2777_v18  ;;  %v2805_v39 = vld [vmem:[%s3315_s25] sm:$0xff]   ;;  %v3345_v41 = vld [vmem:[#allocation7 + $0xe8] ss:$16 sps:$4 sm:$0xff]   ;;  %v3351_v43 = vld [vmem:[#allocation7 + $0xcc] ss:$16 sps:$4 sm:$0xff]   ;;  %v3476_v11 = vshrl.u32 %v387_v10, 7 }
  0x42   : > { %v3347_v42 = vld [vmem:[#allocation7 + $0xc4] ss:$16 sps:$4 sm:$0xff]   ;;  %v3353_v44 = vld [vmem:[#allocation7 + $0xc0] ss:$16 sps:$4 sm:$0xff]   ;;  %v3355_v45 = vld [vmem:[#allocation7 + $0xc8] ss:$16 sps:$4 sm:$0xff]  }
  0x43   : > { %v3359_v46 = vld [vmem:[#allocation7 + $0xa4] ss:$16 sps:$4 sm:$0xff]   ;;  %v3363_v47 = vld [vmem:[#allocation7 + $0xac] ss:$16 sps:$4 sm:$0xff]   ;;  %v3365_v48 = vld [vmem:[#allocation7 + $0xa0] ss:$16 sps:$4 sm:$0xff]  }
  0x44   : > { %586 = vmatpush1.bf16.msra.mxu0 %v2779_v19  ;;  %639 = vmatpush1.bf16.msra.mxu1 %v2780_v20  ;;  %v2836_v49 = vld [vmem:[%s3315_s25 + $0x8] sm:$0xff]   ;;  %v3376_v51 = vld [vmem:[#allocation7 + $0x84] ss:$16 sps:$4 sm:$0xff]   ;;  %v3382_v53 = vld [vmem:[#allocation7 + $0x80] ss:$16 sps:$4 sm:$0xff]   ;;  %3940 = vst [vmem:[#allocation16_spill] sm:$0xff] %v3476_v11 }
  0x45   : > { %587 = vmatprep.subr.bf16.mxu0 %v2781_v21  ;;  %640 = vmatprep.subr.bf16.mxu1 %v2783_v22  ;;  %v3372_v50 = vld [vmem:[#allocation7 + $0xa8] ss:$16 sps:$4 sm:$0xff]   ;;  %v3378_v52 = vld [vmem:[#allocation7 + $0x8c] ss:$16 sps:$4 sm:$0xff]   ;;  %v3386_v55 = vld [vmem:[#allocation7 + $0x64] ss:$16 sps:$4 sm:$0xff]  }
  0x46   : > { %v3384_v54 = vld [vmem:[#allocation7 + $0x88] ss:$16 sps:$4 sm:$0xff]   ;;  %v3390_v56 = vld [vmem:[#allocation7 + $0x6c] ss:$16 sps:$4 sm:$0xff]   ;;  %v3392_v57 = vld [vmem:[#allocation7 + $0x60] ss:$16 sps:$4 sm:$0xff]  }
  0x47   : > { %v3394_v58 = vld [vmem:[#allocation7 + $0x68] ss:$16 sps:$4 sm:$0xff]   ;;  %v3398_v59 = vld [vmem:[#allocation7 + $0x44] ss:$16 sps:$4 sm:$0xff]   ;;  %v3400_v60 = vld [vmem:[#allocation7 + $0x4c] ss:$16 sps:$4 sm:$0xff]  }
  0x48   : > { %588 = vmatpush1.bf16.msra.mxu0 %v2785_v23  ;;  %641 = vmatpush1.bf16.msra.mxu1 %v2786_v24  ;;  %v3406_v61 = vld [vmem:[#allocation7 + $0x40] ss:$16 sps:$4 sm:$0xff]   ;;  %v3408_v62 = vld [vmem:[#allocation7 + $0x48] ss:$16 sps:$4 sm:$0xff]   ;;  %v3410_v63 = vld [vmem:[#allocation7 + $0x24] ss:$16 sps:$4 sm:$0xff]  }
  0x49   : > { %589 = vmatprep.subr.bf16.mxu0 %v2787_v25  ;;  %642 = vmatprep.subr.bf16.mxu1 %v2789_v26  ;;  %v3412_v0 = vld [vmem:[#allocation7 + $0x2c] ss:$16 sps:$4 sm:$0xff]   ;;  %v3418_v1 = vld [vmem:[#allocation7 + $0x20] ss:$16 sps:$4 sm:$0xff]   ;;  %v3420_v2 = vld [vmem:[#allocation7 + $0x28] ss:$16 sps:$4 sm:$0xff]  }
  0x4a   : > { %v3422_v3 = vld [vmem:[#allocation7 + $0x4] ss:$16 sps:$4 sm:$0xff]   ;;  %v3424_v4 = vld [vmem:[#allocation7 + $0xc] ss:$16 sps:$4 sm:$0xff]   ;;  %v3430_v5 = vld [vmem:[#allocation7] ss:$16 sps:$4 sm:$0xff]  }
  0x4b   : > { %v3432_v7 = vld [vmem:[#allocation7 + $0x8] ss:$16 sps:$4 sm:$0xff]   ;;  %v733_v8 = vld [vmem:[#allocation9] sm:$0xff]  ;;  %v3929_v12 = vsub.s32 2, %v3476_v11  ;;  %v3932_v13 = vsub.s32 0, %v3476_v11  ;;  %v3930_v14 = vsub.s32 3, %v3476_v11 }
  0x4c   : > { %590 = vmatpush1.bf16.msra.mxu0 %v2791_v27  ;;  %643 = vmatpush1.bf16.msra.mxu1 %v2792_v28  ;;  %v742_v9 = vpack.c.bf16 %v733_v8, %v733_v8  ;;  %v385_v15 = vld [vmem:[%s3923_s3] sm:$0xf]  ;;  %v3931_v18 = vsub.s32 1, %v3476_v11  ;;  %s2426_s22 = sshll.u32 %s3210_s21, 4  ;;  %p2736_p4 = scmp.eq.s32.totalorder %s3265_s28, 1  ;;  %s2427_s22 = int_to_ptr.vmem [resolvable:$true] %s2426_s22 }
  0x4d   : > { %591 = vmatprep.subr.bf16.mxu0 %v2793_v29  ;;  %644 = vmatprep.subr.bf16.mxu1 %v2795_v30  ;;  %v398_v19 = vrot.slane %v385_v15, %v3929_v12  ;;  %v390_v22 = vrot.slane %v385_v15, %v3932_v13  ;;  %v402_v23 = vrot.slane %v385_v15, %v3930_v14  ;;  %s3133_s23 = scalar_lea.vmem %s2427_s22, 256  ;;  %p3140_p13 = scmp.lt.s32.totalorder %s2427_s22, %s2427_s22 }
  0x4e   : > { %v394_v26 = vrot.slane %v385_v15, %v3931_v18  ;;  %p3134_p6 = scmp.ne.s32.totalorder %s2427_s22, %s3133_s23  ;;  %p3141_p0 = scmp.lt.s32.totalorder %s3133_s23, %s3133_s23 }
  0x50   : > { %592 = vmatpush1.bf16.msra.mxu0 %v2797_v31  ;;  %645 = vmatpush1.bf16.msra.mxu1 %v2798_v32  ;;  %p3135_p7 = pnand %p3134_p6, %p2736_p4  ;;  %p3142_p1 = por %p3141_p0, %p3140_p13 }
  0x51   : > { %593 = vmatprep.subr.bf16.mxu0 %v2799_v33  ;;  %646 = vmatprep.subr.bf16.mxu1 %v2801_v34 }
  0x52   : > { %p3136_p12 = pneg %p3135_p7 }
  0x54   : > { %594 = vmatpush1.bf16.msra.mxu0 %v2803_v35  ;;  %647 = vmatpush1.bf16.msra.mxu1 %v2804_v36  ;;  %p3143_p5 = pnand %p3142_p1, %p3136_p12 }
  0x55   : > { %903 = vmatprep.subr.bf16.mxu0 %v3338_v37  ;;  %944 = vmatprep.subr.bf16.mxu1 %v3340_v38 }
  0x57   : > { %612 = vmatmul.mubr.bf16.vlgmr.msra.gmra.mxu0 %v2805_v39  ;;  %665 = vmatmul.mubr.bf16.vlgmr.msra.gmra.mxu1 %v2805_v39 }
  0x58   : > { %904 = vmatpush1.bf16.msra.mxu0 %v3343_v40  ;;  %945 = vmatpush1.bf16.msra.mxu1 %v3345_v41 }
  0x59   : > { %905 = vmatprep.subr.bf16.mxu0 %v3347_v42  ;;  %946 = vmatprep.subr.bf16.mxu1 %v3351_v43 }
  0x5a   : > { %621 = vmatprep.mubr.bf16.mxu0 %v3933_v6  ;;  %674 = vmatprep.mubr.bf16.mxu1 %v3933_v6 }
  0x5c   : > { %906 = vmatpush1.bf16.msra.mxu0 %v3353_v44  ;;  %947 = vmatpush1.bf16.msra.mxu1 %v3355_v45 }
  0x5d   : > { %907 = vmatprep.subr.bf16.mxu0 %v3359_v46  ;;  %948 = vmatprep.subr.bf16.mxu1 %v3363_v47 }
  0x5f   : > { %622 = vmatmul.mubr.bf16.gmra.mxu0 %v2836_v49  ;;  %675 = vmatmul.mubr.bf16.gmra.mxu1 %v2836_v49 }
  0x60   : > { %908 = vmatpush1.bf16.msra.mxu0 %v3365_v48  ;;  %949 = vmatpush1.bf16.msra.mxu1 %v3372_v50 }
  0x61   : > { %909 = vmatprep.subr.bf16.mxu0 %v3376_v51  ;;  %950 = vmatprep.subr.bf16.mxu1 %v3378_v52 }
  0x62   : > { %935 = vmatprep.mubr.bf16.mxu0 %v3933_v6  ;;  %976 = vmatprep.mubr.bf16.mxu1 %v3933_v6 }
  0x64   : > { %910 = vmatpush1.bf16.msra.mxu0 %v3382_v53  ;;  %951 = vmatpush1.bf16.msra.mxu1 %v3384_v54 }
  0x65   : > { %911 = vmatprep.subr.bf16.mxu0 %v3386_v55  ;;  %952 = vmatprep.subr.bf16.mxu1 %v3390_v56 }
  0x68   : > { %912 = vmatpush1.bf16.msra.mxu0 %v3392_v57  ;;  %953 = vmatpush1.bf16.msra.mxu1 %v3394_v58 }
  0x69   : > { %913 = vmatprep.subr.bf16.mxu0 %v3398_v59  ;;  %954 = vmatprep.subr.bf16.mxu1 %v3400_v60 }
  0x6c   : > { %914 = vmatpush1.bf16.msra.mxu0 %v3406_v61  ;;  %955 = vmatpush1.bf16.msra.mxu1 %v3408_v62 }
  0x6d   : > { %915 = vmatprep.subr.bf16.mxu0 %v3410_v63  ;;  %956 = vmatprep.subr.bf16.mxu1 %v3412_v0 }
  0x70   : > { %916 = vmatpush1.bf16.msra.mxu0 %v3418_v1  ;;  %957 = vmatpush1.bf16.msra.mxu1 %v3420_v2 }
  0x71   : > { %917 = vmatprep.subr.bf16.mxu0 %v3422_v3  ;;  %958 = vmatprep.subr.bf16.mxu1 %v3424_v4 }
  0x74   : > { %918 = vmatpush1.bf16.msra.mxu0 %v3430_v5  ;;  %959 = vmatpush1.bf16.msra.mxu1 %v3432_v7 }
  0x75   : > { %1022 = vmatprep.subr.bf16.mxu0 %v3338_v37  ;;  %1063 = vmatprep.subr.bf16.mxu1 %v3340_v38 }
  0x77   : > { %936 = vmatmul.mubr.bf16.vlgmr.msra.gmra.mxu0 %v742_v9  ;;  %977 = vmatmul.mubr.bf16.vlgmr.msra.gmra.mxu1 %v742_v9 }
  0x78   : > { %1023 = vmatpush1.bf16.msra.mxu0 %v3343_v40  ;;  %1064 = vmatpush1.bf16.msra.mxu1 %v3345_v41 }
  0x79   : > { %1024 = vmatprep.subr.bf16.mxu0 %v3347_v42  ;;  %1065 = vmatprep.subr.bf16.mxu1 %v3351_v43 }
  0x7a   : > { %1054 = vmatprep.mubr.bf16.mxu0 %v3933_v6  ;;  %1095 = vmatprep.mubr.bf16.mxu1 %v3933_v6 }
  0x7c   : > { %1025 = vmatpush1.bf16.msra.mxu0 %v3353_v44  ;;  %1066 = vmatpush1.bf16.msra.mxu1 %v3355_v45 }
  0x7d   : > { %1026 = vmatprep.subr.bf16.mxu0 %v3359_v46  ;;  %1067 = vmatprep.subr.bf16.mxu1 %v3363_v47 }
  0x80   : > { %1027 = vmatpush1.bf16.msra.mxu0 %v3365_v48  ;;  %1068 = vmatpush1.bf16.msra.mxu1 %v3372_v50 }
  0x81   : > { %1028 = vmatprep.subr.bf16.mxu0 %v3376_v51  ;;  %1069 = vmatprep.subr.bf16.mxu1 %v3378_v52 }
  0x84   : > { %1029 = vmatpush1.bf16.msra.mxu0 %v3382_v53  ;;  %1070 = vmatpush1.bf16.msra.mxu1 %v3384_v54 }
  0x85   : > { %1030 = vmatprep.subr.bf16.mxu0 %v3386_v55  ;;  %1071 = vmatprep.subr.bf16.mxu1 %v3390_v56 }
  0x88   : > { %1031 = vmatpush1.bf16.msra.mxu0 %v3392_v57  ;;  %1072 = vmatpush1.bf16.msra.mxu1 %v3394_v58 }
  0x89   : > { %1032 = vmatprep.subr.bf16.mxu0 %v3398_v59  ;;  %1073 = vmatprep.subr.bf16.mxu1 %v3400_v60 }
  0x8c   : > { %1033 = vmatpush1.bf16.msra.mxu0 %v3406_v61  ;;  %1074 = vmatpush1.bf16.msra.mxu1 %v3408_v62 }
  0x8d   : > { %1034 = vmatprep.subr.bf16.mxu0 %v3410_v63  ;;  %1075 = vmatprep.subr.bf16.mxu1 %v3412_v0 }
  0x90   : > { %1035 = vmatpush1.bf16.msra.mxu0 %v3418_v1  ;;  %1076 = vmatpush1.bf16.msra.mxu1 %v3420_v2 }
  0x91   : > { %1036 = vmatprep.subr.bf16.mxu0 %v3422_v3  ;;  %1077 = vmatprep.subr.bf16.mxu1 %v3424_v4 }
  0x94   : > { %1037 = vmatpush1.bf16.msra.mxu0 %v3430_v5  ;;  %1078 = vmatpush1.bf16.msra.mxu1 %v3432_v7 }
  0x95   : > { %1142 = vmatprep.subr.bf16.mxu0 %v3338_v37  ;;  %1183 = vmatprep.subr.bf16.mxu1 %v3340_v38 }
 0x117   : > { %v613_v16 = vpop.f32.mrf.mxu0  ;;  %v666_v17 = vpop.f32.mrf.mxu1 }
 0x119   : > { %v615_v20 = vpop.f32.mrf.mxu0  ;;  %v668_v21 = vpop.f32.mrf.mxu1 }
 0x11a   : > { %v616_v13 = vadd.f32 %v615_v20, %v394_v26 }
 0x11b   : > { %v617_v24 = vpop.f32.mrf.mxu0  ;;  %v670_v25 = vpop.f32.mrf.mxu1 }
 0x11c   : > { %v3493_v27 = vadd.f32 %v617_v24, %v390_v22  ;;  %v3495_v28 = vadd.f32 %v670_v25, %v398_v19 }
 0x11d   : > { %v619_v29 = vpop.f32.mrf.mxu0  ;;  %v672_v30 = vpop.f32.mrf.mxu1 }
 0x11e   : > { %v3497_v31 = vadd.f32 %v619_v29, %v394_v26  ;;  %v3499_v32 = vadd.f32 %v672_v30, %v402_v23 }
 0x11f   : > { %v623_v33 = vpop.f32.mrf.mxu0  ;;  %v676_v34 = vpop.f32.mrf.mxu1 }
 0x120   : > { %v3501_v35 = vadd.f32 %v623_v33, %v390_v22  ;;  %v3503_v36 = vadd.f32 %v676_v34, %v398_v19  ;;  %v614_v34 = vadd.f32 %v613_v16, %v390_v22 }
 0x121   : > { %v625_v39 = vpop.f32.mrf.mxu0  ;;  %v678_v49 = vpop.f32.mrf.mxu1 }
 0x122   : > { %3941 = vst [vmem:[#allocation17_spill] sm:$0xff] %v3503_v36  ;;  %v3505_v8 = vadd.f32 %v625_v39, %v394_v26  ;;  %v3507_v9 = vadd.f32 %v678_v49, %v402_v23 }
 0x123   : > { %v627_v10 = vpop.f32.mrf.mxu0  ;;  %v680_v15 = vpop.f32.mrf.mxu1 }
 0x124   : > { %3942 = vst [vmem:[#allocation18_spill] sm:$0xff] %v3505_v8  ;;  %3943 = vst [vmem:[#allocation19_spill] sm:$0xff] %v3507_v9  ;;  %v3509_v24 = vadd.f32 %v627_v10, %v390_v22  ;;  %v3511_v25 = vadd.f32 %v680_v15, %v398_v19 }
 0x125   : > { %v629_v29 = vpop.f32.mrf.mxu0  ;;  %v682_v30 = vpop.f32.mrf.mxu1 }
 0x126   : > { %3944 = vst [vmem:[#allocation20_spill] sm:$0xff] %v3509_v24  ;;  %3945 = vst [vmem:[#allocation21_spill] sm:$0xff] %v3511_v25  ;;  %v3513_v12 = vadd.f32 %v629_v29, %v394_v26  ;;  %v3515_v33 = vadd.f32 %v682_v30, %v402_v23  ;;  %v669_v29 = vadd.f32 %v668_v21, %v402_v23 }
 0x127   : > { %v667_v30 = vadd.f32 %v666_v17, %v398_v19 }
 0x128   : > { %3946 = vst [vmem:[#allocation22_spill] sm:$0xff] %v3513_v12  ;;  %3947 = vst [vmem:[#allocation23_spill] sm:$0xff] %v3515_v33 }
 0x137   : > { %v937_v14 = vpop.f32.mrf.mxu0  ;;  %v978_v18 = vpop.f32.mrf.mxu1 }
 0x138   : > { %v985_v39 = vadd.f32 %v937_v14, %v614_v34  ;;  %v987_v22 = vadd.f32 %v978_v18, %v667_v30 }
 0x139   : > { %v939_v6 = vpop.f32.mrf.mxu0  ;;  %v980_v49 = vpop.f32.mrf.mxu1 }
 0x13a   : > { %v2609_v11 = vmul.f32 -1.442695, %v985_v39  ;;  %v986_v36 = vadd.f32 %v939_v6, %v616_v13  ;;  %v988_v12 = vadd.f32 %v980_v49, %v669_v29 }
 0x13b   : > { %v941_v9 = vpop.f32.mrf.mxu0  ;;  %v982_v10 = vpop.f32.mrf.mxu1 }
 0x13c   : > { %2953 = vpow2.f32 %v2609_v11  ;;  %v2610_v15 = vmul.f32 -1.442695, %v986_v36  ;;  %v2611_v33 = vmul.f32 -1.442695, %v988_v12  ;;  %v734_v11 = vld [vmem:[#allocation10] sm:$0xff] }
 0x13d   : > { %v942_v25 = vpop.f32.mrf.mxu0  ;;  %v983_v24 = vpop.f32.mrf.mxu1 }
 0x13e   : > { %2955 = vpow2.f32 %v2610_v15 }
 0x13f   : > { %2957 = vpow2.f32 %v2611_v33 }
 0x149   : > { %v2954_v16 = vpop.eup %2953 }
 0x14a   : > { %v992_v8 = vadd.f32 1.0, %v2954_v16 }
 0x14b   : > { %v2956_v20 = vpop.eup %2955 }
 0x14c   : > { %2959 = vrcp.f32 %v992_v8  ;;  %v998_v14 = vadd.f32 1.0, %v2956_v20  ;;  %v2958_v6 = vpop.eup %2957  ;;  %v3948_v8 = vmov 0  }
 0x14d   : > { %2961 = vtanh.f32 %v987_v22  ;;  %v1005_v9 = vadd.f32 1.0, %v2958_v6 }
 0x14e   : > { %2963 = vrcp.f32 %v998_v14 }
 0x14f   : > { %2965 = vrcp.f32 %v1005_v9 }
 0x159   : > { %v2960_v13 = vpop.eup %2959 }
 0x15a   : > { %v2962_v26 = vpop.eup %2961 }
 0x15b   : > { %v2964_v36 = vpop.eup %2963  ;;  %v1009_v24 = vmul.f32 %v2962_v26, %v2960_v13 }
 0x15c   : > { %v1008_v21 = vmul.f32 %v2964_v36, %v734_v11  ;;  %v2966_v12 = vpop.eup %2965 }
 0x15e   : > { %v3517_v23 = vadd.f32 %v1009_v24, %v1008_v21 }
 0x160   : > { %2967 = vtanh.f32 %v3517_v23 }
 0x16d   : > { %v2968_v17 = vpop.eup %2967 }
 0x16e   : > { %v1012_v18 = vmul.f32 %v2968_v17, %v2966_v12 }
 0x170   : > { %v1013_v19 = vpack.c.bf16 %v1012_v18, %v1012_v18 }
 0x172   : > { %1014 = vst [vmem:[#allocation3] sm:$0xf] %v1013_v19  ;;  %1055 = vmatmul.mubr.bf16.vlgmr.msra.gmra.mxu0 %v1013_v19  ;;  %1096 = vmatmul.mubr.bf16.vlgmr.msra.gmra.mxu1 %v1013_v19 }
 0x173   : > { %1143 = vmatpush1.bf16.msra.mxu0 %v3343_v40  ;;  %1184 = vmatpush1.bf16.msra.mxu1 %v3345_v41 }
 0x174   : > { %1144 = vmatprep.subr.bf16.mxu0 %v3347_v42  ;;  %1185 = vmatprep.subr.bf16.mxu1 %v3351_v43 }
 0x175   : > { %1174 = vmatprep.mubr.bf16.mxu0 %v3948_v8  ;;  %1215 = vmatprep.mubr.bf16.mxu1 %v3948_v8 }
 0x177   : > { %1145 = vmatpush1.bf16.msra.mxu0 %v3353_v44  ;;  %1186 = vmatpush1.bf16.msra.mxu1 %v3355_v45 }
 0x178   : > { %1146 = vmatprep.subr.bf16.mxu0 %v3359_v46  ;;  %1187 = vmatprep.subr.bf16.mxu1 %v3363_v47 }
 0x17b   : > { %1147 = vmatpush1.bf16.msra.mxu0 %v3365_v48  ;;  %1188 = vmatpush1.bf16.msra.mxu1 %v3372_v50 }
 0x17c   : > { %1148 = vmatprep.subr.bf16.mxu0 %v3376_v51  ;;  %1189 = vmatprep.subr.bf16.mxu1 %v3378_v52 }
 0x17f   : > { %1149 = vmatpush1.bf16.msra.mxu0 %v3382_v53  ;;  %1190 = vmatpush1.bf16.msra.mxu1 %v3384_v54 }
 0x180   : > { %1150 = vmatprep.subr.bf16.mxu0 %v3386_v55  ;;  %1191 = vmatprep.subr.bf16.mxu1 %v3390_v56 }
 0x183   : > { %1151 = vmatpush1.bf16.msra.mxu0 %v3392_v57  ;;  %1192 = vmatpush1.bf16.msra.mxu1 %v3394_v58 }
 0x184   : > { %1152 = vmatprep.subr.bf16.mxu0 %v3398_v59  ;;  %1193 = vmatprep.subr.bf16.mxu1 %v3400_v60 }
 0x187   : > { %1153 = vmatpush1.bf16.msra.mxu0 %v3406_v61  ;;  %1194 = vmatpush1.bf16.msra.mxu1 %v3408_v62 }
 0x188   : > { %1154 = vmatprep.subr.bf16.mxu0 %v3410_v63  ;;  %1195 = vmatprep.subr.bf16.mxu1 %v3412_v0 }
 0x18b   : > { %1155 = vmatpush1.bf16.msra.mxu0 %v3418_v1  ;;  %1196 = vmatpush1.bf16.msra.mxu1 %v3420_v2 }
 0x18c   : > { %1156 = vmatprep.subr.bf16.mxu0 %v3422_v3  ;;  %1197 = vmatprep.subr.bf16.mxu1 %v3424_v4 }
 0x18f   : > { %1157 = vmatpush1.bf16.msra.mxu0 %v3430_v5  ;;  %1198 = vmatpush1.bf16.msra.mxu1 %v3432_v7 }
 0x190   : > { %1262 = vmatprep.subr.bf16.mxu0 %v3338_v37  ;;  %1303 = vmatprep.subr.bf16.mxu1 %v3340_v38 }
 0x232   : > { %v1056_v25 = vpop.f32.mrf.mxu0  ;;  %v1097_v33 = vpop.f32.mrf.mxu1 }
 0x233   : > { %v1104_v34 = vadd.f32 %v1056_v25, %v3493_v27  ;;  %v1106_v38 = vadd.f32 %v1097_v33, %v3495_v28 }
 0x234   : > { %v1058_v39 = vpop.f32.mrf.mxu0  ;;  %v1099_v49 = vpop.f32.mrf.mxu1 }
 0x235   : > { %v2612_v10 = vmul.f32 -1.442695, %v1104_v34  ;;  %v1105_v15 = vadd.f32 %v1058_v39, %v3497_v31  ;;  %v1107_v37 = vadd.f32 %v1099_v49, %v3499_v32  ;;  %v2855_v39 = vld [vmem:[#allocation4 + $0x1e0] ss:$16 sps:$4 sm:$0xff]   ;;  %v2858_v49 = vld [vmem:[#allocation4 + $0x1e8] ss:$16 sps:$4 sm:$0xff]  }
 0x236   : > { %v1060_v29 = vpop.f32.mrf.mxu0  ;;  %v1101_v30 = vpop.f32.mrf.mxu1 }
 0x237   : > { %2969 = vpow2.f32 %v2612_v10  ;;  %v2613_v16 = vmul.f32 -1.442695, %v1105_v15  ;;  %v2614_v14 = vmul.f32 -1.442695, %v1107_v37  ;;  %v2863_v15 = vld [vmem:[#allocation4 + $0x1c4] ss:$16 sps:$4 sm:$0xff]  }
 0x238   : > { %v1061_v22 = vpop.f32.mrf.mxu0  ;;  %v1102_v20 = vpop.f32.mrf.mxu1  ;;  %v2866_v29 = vld [vmem:[#allocation4 + $0x1cc] ss:$16 sps:$4 sm:$0xff]   ;;  %v2861_v30 = vld [vmem:[#allocation4 + $0x1c0] ss:$16 sps:$4 sm:$0xff]  }
 0x239   : > { %2971 = vpow2.f32 %v2613_v16  ;;  %v2864_v16 = vld [vmem:[#allocation4 + $0x1c8] ss:$16 sps:$4 sm:$0xff]   ;;  %v2869_v22 = vld [vmem:[#allocation4 + $0x1a4] ss:$16 sps:$4 sm:$0xff]   ;;  %v2872_v20 = vld [vmem:[#allocation4 + $0x1ac] ss:$16 sps:$4 sm:$0xff]  }
 0x23a   : > { %2973 = vtanh.f32 %v1106_v38  ;;  %v2867_v37 = vld [vmem:[#allocation4 + $0x1a0] ss:$16 sps:$4 sm:$0xff]   ;;  %v2870_v38 = vld [vmem:[#allocation4 + $0x1a8] ss:$16 sps:$4 sm:$0xff]  }
 0x23b   : > { %2975 = vpow2.f32 %v2614_v14  ;;  %v2875_v14 = vld [vmem:[#allocation4 + $0x184] ss:$16 sps:$4 sm:$0xff]  }
 0x244   : > { %v2970_v6 = vpop.eup %2969 }
 0x245   : > { %v1111_v13 = vadd.f32 1.0, %v2970_v6  ;;  %v2878_v6 = vld [vmem:[#allocation4 + $0x18c] ss:$16 sps:$4 sm:$0xff]  }
 0x246   : > { %v2972_v27 = vpop.eup %2971 }
 0x247   : > { %2977 = vrcp.f32 %v1111_v13  ;;  %v1117_v11 = vadd.f32 1.0, %v2972_v27  ;;  %v2974_v31 = vpop.eup %2973  ;;  %v2873_v13 = vld [vmem:[#allocation4 + $0x180] ss:$16 sps:$4 sm:$0xff]   ;;  %v2876_v27 = vld [vmem:[#allocation4 + $0x188] ss:$16 sps:$4 sm:$0xff]  }
 0x248   : > { %v2976_v26 = vpop.eup %2975 }
 0x249   : > { %2979 = vrcp.f32 %v1117_v11  ;;  %v1124_v21 = vadd.f32 1.0, %v2976_v26  ;;  %v2881_v11 = vld [vmem:[#allocation4 + $0x164] ss:$16 sps:$4 sm:$0xff]   ;;  %v2879_v26 = vld [vmem:[#allocation4 + $0x160] ss:$16 sps:$4 sm:$0xff]  }
 0x24b   : > { %2981 = vrcp.f32 %v1124_v21  ;;  %v2885_v21 = vld [vmem:[#allocation4 + $0x140] ss:$16 sps:$4 sm:$0xff]  }
 0x254   : > { %v2978_v36 = vpop.eup %2977 }
 0x255   : > { %v1128_v9 = vmul.f32 %v2978_v36, %v2974_v31  ;;  %v2884_v31 = vld [vmem:[#allocation4 + $0x16c] ss:$16 sps:$4 sm:$0xff]   ;;  %v2882_v36 = vld [vmem:[#allocation4 + $0x168] ss:$16 sps:$4 sm:$0xff]  }
 0x256   : > { %v2980_v24 = vpop.eup %2979 }
 0x257   : > { %v1127_v12 = vmul.f32 %v2980_v24, %v3517_v23  ;;  %v2890_v24 = vld [vmem:[#allocation4 + $0x14c] ss:$16 sps:$4 sm:$0xff]  }
 0x258   : > { %v2982_v28 = vpop.eup %2981 }
 0x259   : > { %v3559_v32 = vadd.f32 %v1128_v9, %v1127_v12  ;;  %v2887_v9 = vld [vmem:[#allocation4 + $0x144] ss:$16 sps:$4 sm:$0xff]   ;;  %v2888_v12 = vld [vmem:[#allocation4 + $0x148] ss:$16 sps:$4 sm:$0xff]  }
 0x25b   : > { %2983 = vtanh.f32 %v3559_v32 }
 0x268   : > { %v2984_v17 = vpop.eup %2983 }
 0x269   : > { %v1131_v18 = vmul.f32 %v2984_v17, %v2982_v28  ;;  %v2896_v28 = vld [vmem:[#allocation4 + $0x12c] ss:$16 sps:$4 sm:$0xff]   ;;  %v2891_v17 = vld [vmem:[#allocation4 + $0x120] ss:$16 sps:$4 sm:$0xff]  }
 0x26b   : > { %v1132_v19 = vpack.c.bf16 %v1131_v18, %v1131_v18  ;;  %v2894_v18 = vld [vmem:[#allocation4 + $0x128] ss:$16 sps:$4 sm:$0xff]  }
 0x26d   : > { %1134 = vst [vmem:[#allocation3 + $0x4] sm:$0xf] %v1132_v19  ;;  %1175 = vmatmul.mubr.bf16.vlgmr.msra.gmra.mxu0 %v1132_v19  ;;  %1216 = vmatmul.mubr.bf16.vlgmr.msra.gmra.mxu1 %v1132_v19  ;;  %v2899_v19 = vld [vmem:[#allocation4 + $0x104] ss:$16 sps:$4 sm:$0xff]  }
 0x26e   : > { %1263 = vmatpush1.bf16.msra.mxu0 %v3343_v40  ;;  %1304 = vmatpush1.bf16.msra.mxu1 %v3345_v41  ;;  %v2857_v40 = vld [vmem:[#allocation4 + $0x1e4] ss:$16 sps:$4 sm:$0xff]   ;;  %v2860_v41 = vld [vmem:[#allocation4 + $0x1ec] ss:$16 sps:$4 sm:$0xff]  }
 0x26f   : > { %1264 = vmatprep.subr.bf16.mxu0 %v3347_v42  ;;  %1305 = vmatprep.subr.bf16.mxu1 %v3351_v43 }
 0x270   : > { %1294 = vmatprep.mubr.bf16.mxu0 %v3948_v8  ;;  %1335 = vmatprep.mubr.bf16.mxu1 %v3948_v8 }
 0x272   : > { %1265 = vmatpush1.bf16.msra.mxu0 %v3353_v44  ;;  %1306 = vmatpush1.bf16.msra.mxu1 %v3355_v45 }
 0x273   : > { %1266 = vmatprep.subr.bf16.mxu0 %v3359_v46  ;;  %1307 = vmatprep.subr.bf16.mxu1 %v3363_v47 }
 0x276   : > { %1267 = vmatpush1.bf16.msra.mxu0 %v3365_v48  ;;  %1308 = vmatpush1.bf16.msra.mxu1 %v3372_v50  ;;  %v3949_v48 = vld [vmem:[#allocation18_spill] sm:$0xff] }
 0x277   : > { %1268 = vmatprep.subr.bf16.mxu0 %v3376_v51  ;;  %1309 = vmatprep.subr.bf16.mxu1 %v3378_v52 }
 0x27a   : > { %1269 = vmatpush1.bf16.msra.mxu0 %v3382_v53  ;;  %1310 = vmatpush1.bf16.msra.mxu1 %v3384_v54 }
 0x27b   : > { %1270 = vmatprep.subr.bf16.mxu0 %v3386_v55  ;;  %1311 = vmatprep.subr.bf16.mxu1 %v3390_v56  ;;  %v3950_v56 = vld [vmem:[#allocation19_spill] sm:$0xff] }
 0x27e   : > { %1271 = vmatpush1.bf16.msra.mxu0 %v3392_v57  ;;  %1312 = vmatpush1.bf16.msra.mxu1 %v3394_v58  ;;  %v3951_v58 = vld [vmem:[#allocation17_spill] sm:$0xff] }
 0x27f   : > { %1272 = vmatprep.subr.bf16.mxu0 %v3398_v59  ;;  %1313 = vmatprep.subr.bf16.mxu1 %v3400_v60 }
 0x282   : > { %1273 = vmatpush1.bf16.msra.mxu0 %v3406_v61  ;;  %1314 = vmatpush1.bf16.msra.mxu1 %v3408_v62 }
 0x283   : > { %1274 = vmatprep.subr.bf16.mxu0 %v3410_v63  ;;  %1315 = vmatprep.subr.bf16.mxu1 %v3412_v0 }
 0x286   : > { %1275 = vmatpush1.bf16.msra.mxu0 %v3418_v1  ;;  %1316 = vmatpush1.bf16.msra.mxu1 %v3420_v2 }
 0x287   : > { %1276 = vmatprep.subr.bf16.mxu0 %v3422_v3  ;;  %1317 = vmatprep.subr.bf16.mxu1 %v3424_v4 }
 0x28a   : > { %1277 = vmatpush1.bf16.msra.mxu0 %v3430_v5  ;;  %1318 = vmatpush1.bf16.msra.mxu1 %v3432_v7 }
 0x28b   : > { %1609 = vmatprep.subr.bf16.mxu0 %v2857_v40  ;;  %1662 = vmatprep.subr.bf16.mxu1 %v2860_v41  ;;  %v2902_v40 = vld [vmem:[#allocation4 + $0x10c] ss:$16 sps:$4 sm:$0xff]   ;;  %v2897_v41 = vld [vmem:[#allocation4 + $0x100] ss:$16 sps:$4 sm:$0xff]  }
 0x32d   : > { %v1176_v42 = vpop.f32.mrf.mxu0  ;;  %v1217_v43 = vpop.f32.mrf.mxu1 }
 0x32e   : > { %v1224_v44 = vadd.f32 %v1176_v42, %v3501_v35  ;;  %v1226_v59 = vadd.f32 %v1217_v43, %v3951_v58  ;;  %v2900_v42 = vld [vmem:[#allocation4 + $0x108] ss:$16 sps:$4 sm:$0xff]   ;;  %v2903_v43 = vld [vmem:[#allocation3] sm:$0xff]   ;;  %v3644_v58 = vld [vmem:[#allocation7 + $0x18c] ss:$16 sps:$4 sm:$0xff]  }
 0x32f   : > { %v1178_v45 = vpop.f32.mrf.mxu0  ;;  %v1219_v46 = vpop.f32.mrf.mxu1 }
 0x330   : > { %v2615_v47 = vmul.f32 -1.442695, %v1224_v44  ;;  %v1225_v50 = vadd.f32 %v1178_v45, %v3949_v48  ;;  %v1227_v57 = vadd.f32 %v1219_v46, %v3950_v56  ;;  %v3606_v44 = vld [vmem:[#allocation7 + $0x1e4] ss:$16 sps:$4 sm:$0xff]   ;;  %v3608_v45 = vld [vmem:[#allocation7 + $0x1ec] ss:$16 sps:$4 sm:$0xff]  }
 0x331   : > { %v1180_v51 = vpop.f32.mrf.mxu0  ;;  %v1221_v52 = vpop.f32.mrf.mxu1  ;;  %v3610_v46 = vld [vmem:[#allocation7 + $0x1e0] ss:$16 sps:$4 sm:$0xff]   ;;  %v3618_v48 = vld [vmem:[#allocation7 + $0x1c4] ss:$16 sps:$4 sm:$0xff]   ;;  %v3636_v56 = vld [vmem:[#allocation7 + $0x1a8] ss:$16 sps:$4 sm:$0xff]  }
 0x332   : > { %2985 = vpow2.f32 %v2615_v47  ;;  %v2616_v53 = vmul.f32 -1.442695, %v1225_v50  ;;  %v2617_v60 = vmul.f32 -1.442695, %v1227_v57  ;;  %v3612_v47 = vld [vmem:[#allocation7 + $0x1e8] ss:$16 sps:$4 sm:$0xff]  }
 0x333   : > { %v1181_v54 = vpop.f32.mrf.mxu0  ;;  %v1222_v55 = vpop.f32.mrf.mxu1  ;;  %v3620_v50 = vld [vmem:[#allocation7 + $0x1cc] ss:$16 sps:$4 sm:$0xff]   ;;  %v3622_v51 = vld [vmem:[#allocation7 + $0x1c0] ss:$16 sps:$4 sm:$0xff]   ;;  %v3624_v52 = vld [vmem:[#allocation7 + $0x1c8] ss:$16 sps:$4 sm:$0xff]  }
 0x334   : > { %2987 = vpow2.f32 %v2616_v53  ;;  %v3630_v53 = vld [vmem:[#allocation7 + $0x1a4] ss:$16 sps:$4 sm:$0xff]   ;;  %v3632_v54 = vld [vmem:[#allocation7 + $0x1ac] ss:$16 sps:$4 sm:$0xff]   ;;  %v3634_v55 = vld [vmem:[#allocation7 + $0x1a0] ss:$16 sps:$4 sm:$0xff]  }
 0x335   : > { %2989 = vtanh.f32 %v1226_v59  ;;  %v3642_v57 = vld [vmem:[#allocation7 + $0x184] ss:$16 sps:$4 sm:$0xff]   ;;  %v3646_v59 = vld [vmem:[#allocation7 + $0x180] ss:$16 sps:$4 sm:$0xff]  }
 0x336   : > { %2991 = vpow2.f32 %v2617_v60  ;;  %v3648_v60 = vld [vmem:[#allocation7 + $0x188] ss:$16 sps:$4 sm:$0xff]  }
 0x33f   : > { %v2986_v61 = vpop.eup %2985 }
 0x340   : > { %v1231_v62 = vadd.f32 1.0, %v2986_v61  ;;  %v3654_v61 = vld [vmem:[#allocation7 + $0x164] ss:$16 sps:$4 sm:$0xff]  }
 0x341   : > { %v2988_v63 = vpop.eup %2987 }
 0x342   : > { %2993 = vrcp.f32 %v1231_v62  ;;  %v1237_v0 = vadd.f32 1.0, %v2988_v63  ;;  %v2990_v1 = vpop.eup %2989  ;;  %v3656_v62 = vld [vmem:[#allocation7 + $0x16c] ss:$16 sps:$4 sm:$0xff]   ;;  %v3658_v63 = vld [vmem:[#allocation7 + $0x160] ss:$16 sps:$4 sm:$0xff]  }
 0x343   : > { %v2992_v2 = vpop.eup %2991 }
 0x344   : > { %2995 = vrcp.f32 %v1237_v0  ;;  %v1244_v7 = vadd.f32 1.0, %v2992_v2  ;;  %v3660_v0 = vld [vmem:[#allocation7 + $0x168] ss:$16 sps:$4 sm:$0xff]   ;;  %v3664_v2 = vld [vmem:[#allocation7 + $0x14c] ss:$16 sps:$4 sm:$0xff]  }
 0x346   : > { %2997 = vrcp.f32 %v1244_v7  ;;  %v3680_v7 = vld [vmem:[#allocation7 + $0x12c] ss:$16 sps:$4 sm:$0xff]  }
 0x34f   : > { %v2994_v3 = vpop.eup %2993 }
 0x350   : > { %v1248_v4 = vmul.f32 %v2994_v3, %v2990_v1  ;;  %v3662_v1 = vld [vmem:[#allocation7 + $0x144] ss:$16 sps:$4 sm:$0xff]   ;;  %v3670_v3 = vld [vmem:[#allocation7 + $0x140] ss:$16 sps:$4 sm:$0xff]  }
 0x351   : > { %v2996_v5 = vpop.eup %2995 }
 0x352   : > { %v1247_v35 = vmul.f32 %v2996_v5, %v3559_v32  ;;  %v2893_v32 = vld [vmem:[#allocation4 + $0x124] ss:$16 sps:$4 sm:$0xff]  }
 0x353   : > { %v2998_v25 = vpop.eup %2997  ;;  %v3678_v5 = vld [vmem:[#allocation7 + $0x124] ss:$16 sps:$4 sm:$0xff]  }
 0x354   : > { %v3599_v23 = vadd.f32 %v1248_v4, %v1247_v35  ;;  %v3672_v4 = vld [vmem:[#allocation7 + $0x148] ss:$16 sps:$4 sm:$0xff]   ;;  %v3682_v35 = vld [vmem:[#allocation7 + $0x120] ss:$16 sps:$4 sm:$0xff]  }
 0x356   : > { %2999 = vtanh.f32 %v3599_v23 }
 0x363   : > { %v3000_v33 = vpop.eup %2999 }
 0x364   : > { %v1251_v34 = vmul.f32 %v3000_v33, %v2998_v25  ;;  %v3684_v25 = vld [vmem:[#allocation7 + $0x128] ss:$16 sps:$4 sm:$0xff]   ;;  %v3686_v33 = vld [vmem:[#allocation7 + $0x104] ss:$16 sps:$4 sm:$0xff]  }
 0x366   : > { %v1252_v10 = vpack.c.bf16 %v1251_v34, %v1251_v34  ;;  %v3690_v34 = vld [vmem:[#allocation7 + $0x10c] ss:$16 sps:$4 sm:$0xff]  }
 0x368   : > { %1254 = vst [vmem:[#allocation3 + $0x8] sm:$0xf] %v1252_v10  ;;  %1295 = vmatmul.mubr.bf16.vlgmr.msra.gmra.mxu0 %v1252_v10  ;;  %1336 = vmatmul.mubr.bf16.vlgmr.msra.gmra.mxu1 %v1252_v10 }
 0x369   : > { %1610 = vmatpush1.bf16.msra.mxu0 %v2855_v39  ;;  %1663 = vmatpush1.bf16.msra.mxu1 %v2858_v49  ;;  %v3694_v39 = vld [vmem:[#allocation7 + $0x100] ss:$16 sps:$4 sm:$0xff]   ;;  %v3696_v49 = vld [vmem:[#allocation7 + $0x108] ss:$16 sps:$4 sm:$0xff]  }
 0x36a   : > { %1611 = vmatprep.subr.bf16.mxu0 %v2863_v15  ;;  %1664 = vmatprep.subr.bf16.mxu1 %v2866_v29  ;;  %v3952_v29 = vld [vmem:[#allocation20_spill] sm:$0xff] }
 0x36b   : > { %1641 = vmatprep.mubr.bf16.mxu0 %v3948_v8  ;;  %1694 = vmatprep.mubr.bf16.mxu1 %v3948_v8 }
 0x36d   : > { %1612 = vmatpush1.bf16.msra.mxu0 %v2861_v30  ;;  %1665 = vmatpush1.bf16.msra.mxu1 %v2864_v16 }
 0x36e   : > { %1613 = vmatprep.subr.bf16.mxu0 %v2869_v22  ;;  %1666 = vmatprep.subr.bf16.mxu1 %v2872_v20 }
 0x371   : > { %1614 = vmatpush1.bf16.msra.mxu0 %v2867_v37  ;;  %1667 = vmatpush1.bf16.msra.mxu1 %v2870_v38  ;;  %v3953_v37 = vld [vmem:[#allocation22_spill] sm:$0xff] }
 0x372   : > { %1615 = vmatprep.subr.bf16.mxu0 %v2875_v14  ;;  %1668 = vmatprep.subr.bf16.mxu1 %v2878_v6 }
 0x375   : > { %1616 = vmatpush1.bf16.msra.mxu0 %v2873_v13  ;;  %1669 = vmatpush1.bf16.msra.mxu1 %v2876_v27 }
 0x376   : > { %1617 = vmatprep.subr.bf16.mxu0 %v2881_v11  ;;  %1670 = vmatprep.subr.bf16.mxu1 %v2884_v31  ;;  %v3954_v31 = vld [vmem:[#allocation23_spill] sm:$0xff] }
 0x379   : > { %1618 = vmatpush1.bf16.msra.mxu0 %v2879_v26  ;;  %1671 = vmatpush1.bf16.msra.mxu1 %v2882_v36  ;;  %v3955_v36 = vld [vmem:[#allocation21_spill] sm:$0xff] }
 0x37a   : > { %1619 = vmatprep.subr.bf16.mxu0 %v2887_v9  ;;  %1672 = vmatprep.subr.bf16.mxu1 %v2890_v24 }
 0x37d   : > { %1620 = vmatpush1.bf16.msra.mxu0 %v2885_v21  ;;  %1673 = vmatpush1.bf16.msra.mxu1 %v2888_v12 }
 0x37e   : > { %1621 = vmatprep.subr.bf16.mxu0 %v2893_v32  ;;  %1674 = vmatprep.subr.bf16.mxu1 %v2896_v28 }
 0x381   : > { %1622 = vmatpush1.bf16.msra.mxu0 %v2891_v17  ;;  %1675 = vmatpush1.bf16.msra.mxu1 %v2894_v18 }
 0x382   : > { %1623 = vmatprep.subr.bf16.mxu0 %v2899_v19  ;;  %1676 = vmatprep.subr.bf16.mxu1 %v2902_v40 }
 0x385   : > { %1624 = vmatpush1.bf16.msra.mxu0 %v2897_v41  ;;  %1677 = vmatpush1.bf16.msra.mxu1 %v2900_v42 }
 0x386   : > { %1933 = vmatprep.subr.bf16.mxu0 %v3606_v44  ;;  %1974 = vmatprep.subr.bf16.mxu1 %v3608_v45 }
 0x388   : > { %1642 = vmatmul.mubr.bf16.vlgmr.msra.gmra.mxu0 %v2903_v43  ;;  %1695 = vmatmul.mubr.bf16.vlgmr.msra.gmra.mxu1 %v2903_v43 }
 0x389   : > { %1651 = vmatprep.mubr.bf16.mxu0 %v3948_v8  ;;  %1704 = vmatprep.mubr.bf16.mxu1 %v3948_v8 }
 0x38a   : > { %1934 = vmatpush1.bf16.msra.mxu0 %v3610_v46  ;;  %1975 = vmatpush1.bf16.msra.mxu1 %v3612_v47 }
 0x38b   : > { %1935 = vmatprep.subr.bf16.mxu0 %v3618_v48  ;;  %1976 = vmatprep.subr.bf16.mxu1 %v3620_v50 }
 0x38e   : > { %1936 = vmatpush1.bf16.msra.mxu0 %v3622_v51  ;;  %1977 = vmatpush1.bf16.msra.mxu1 %v3624_v52 }
 0x38f   : > { %1937 = vmatprep.subr.bf16.mxu0 %v3630_v53  ;;  %1978 = vmatprep.subr.bf16.mxu1 %v3632_v54 }
 0x392   : > { %1938 = vmatpush1.bf16.msra.mxu0 %v3634_v55  ;;  %1979 = vmatpush1.bf16.msra.mxu1 %v3636_v56 }
 0x393   : > { %1939 = vmatprep.subr.bf16.mxu0 %v3642_v57  ;;  %1980 = vmatprep.subr.bf16.mxu1 %v3644_v58 }
 0x396   : > { %1940 = vmatpush1.bf16.msra.mxu0 %v3646_v59  ;;  %1981 = vmatpush1.bf16.msra.mxu1 %v3648_v60 }
 0x397   : > { %1941 = vmatprep.subr.bf16.mxu0 %v3654_v61  ;;  %1982 = vmatprep.subr.bf16.mxu1 %v3656_v62 }
 0x39a   : > { %1942 = vmatpush1.bf16.msra.mxu0 %v3658_v63  ;;  %1983 = vmatpush1.bf16.msra.mxu1 %v3660_v0 }
 0x39b   : > { %1943 = vmatprep.subr.bf16.mxu0 %v3662_v1  ;;  %1984 = vmatprep.subr.bf16.mxu1 %v3664_v2 }
 0x39e   : > { %1944 = vmatpush1.bf16.msra.mxu0 %v3670_v3  ;;  %1985 = vmatpush1.bf16.msra.mxu1 %v3672_v4 }
 0x39f   : > { %1945 = vmatprep.subr.bf16.mxu0 %v3678_v5  ;;  %1986 = vmatprep.subr.bf16.mxu1 %v3680_v7 }
 0x3a2   : > { %1946 = vmatpush1.bf16.msra.mxu0 %v3682_v35  ;;  %1987 = vmatpush1.bf16.msra.mxu1 %v3684_v25 }
 0x3a3   : > { %1947 = vmatprep.subr.bf16.mxu0 %v3686_v33  ;;  %1988 = vmatprep.subr.bf16.mxu1 %v3690_v34 }
 0x3a6   : > { %1948 = vmatpush1.bf16.msra.mxu0 %v3694_v39  ;;  %1989 = vmatpush1.bf16.msra.mxu1 %v3696_v49 }
 0x3a7   : > { %2049 = vmatprep.subr.bf16.mxu0 %v3606_v44  ;;  %2090 = vmatprep.subr.bf16.mxu1 %v3608_v45 }
 0x428   : > { %v1296_v10 = vpop.f32.mrf.mxu0  ;;  %v1337_v15 = vpop.f32.mrf.mxu1 }
 0x429   : > { %v1344_v30 = vadd.f32 %v1296_v10, %v3952_v29  ;;  %v1346_v9 = vadd.f32 %v1337_v15, %v3955_v36 }
 0x42a   : > { %v1298_v16 = vpop.f32.mrf.mxu0  ;;  %v1339_v22 = vpop.f32.mrf.mxu1 }
 0x42b   : > { %v2618_v20 = vmul.f32 -1.442695, %v1344_v30  ;;  %v1345_v38 = vadd.f32 %v1298_v16, %v3953_v37  ;;  %v1347_v26 = vadd.f32 %v1339_v22, %v3954_v31 }
 0x42c   : > { %v1300_v14 = vpop.f32.mrf.mxu0  ;;  %v1341_v6 = vpop.f32.mrf.mxu1 }
 0x42d   : > { %3001 = vpow2.f32 %v2618_v20  ;;  %v2619_v13 = vmul.f32 -1.442695, %v1345_v38  ;;  %v2620_v24 = vmul.f32 -1.442695, %v1347_v26  ;;  %v1765_v20 = vld [vmem:[#allocation9 + $0x8] sm:$0xff] }
 0x42e   : > { %v1301_v27 = vpop.f32.mrf.mxu0  ;;  %v1342_v11 = vpop.f32.mrf.mxu1  ;;  %v1772_v37 = vpack.c.bf16 %v1765_v20, %v1765_v20  ;;  %v2621_v26 = vld [vmem:[%s3923_s3 + $0x4] sm:$0xf] }
 0x42f   : > { %3003 = vpow2.f32 %v2619_v13 }
 0x430   : > { %3005 = vtanh.f32 %v1346_v9 }
 0x431   : > { %3007 = vpow2.f32 %v2620_v24 }
 0x43a   : > { %v3002_v21 = vpop.eup %3001 }
 0x43b   : > { %v1351_v12 = vadd.f32 1.0, %v3002_v21 }
 0x43c   : > { %v3004_v32 = vpop.eup %3003 }
 0x43d   : > { %3009 = vrcp.f32 %v1351_v12  ;;  %v1357_v28 = vadd.f32 1.0, %v3004_v32  ;;  %v3006_v17 = vpop.eup %3005  ;;  %v3957_v12 = vld [vmem:[#allocation16_spill] sm:$0xff] }
 0x43e   : > { %v3008_v18 = vpop.eup %3007  ;;  %v3958_v32 = vsub.s32 0, %v3957_v12 }
 0x43f   : > { %3011 = vrcp.f32 %v1357_v28  ;;  %v1364_v42 = vadd.f32 1.0, %v3008_v18 }
 0x440   : > { %v3766_v28 = vrot.slane %v2621_v26, %v3958_v32 }
 0x441   : > { %3013 = vrcp.f32 %v1364_v42 }
 0x448   : > { %v1696_v38 = vpop.f32.mrf.mxu1 }
 0x44a   : > { %v3010_v19 = vpop.eup %3009  ;;  %v1698_v6 = vpop.f32.mrf.mxu1 }
 0x44b   : > { %v1368_v40 = vmul.f32 %v3010_v19, %v3006_v17  ;;  %v3961_v19 = vsub.s32 1, %v3957_v12 }
 0x44c   : > { %v3012_v41 = vpop.eup %3011  ;;  %v3747_v27 = vpop.f32.mrf.mxu1 }
 0x44d   : > { %v1367_v43 = vmul.f32 %v3012_v41, %v3599_v23  ;;  %v1643_v23 = vpop.f32.mrf.mxu0 }
 0x44e   : > { %v3014_v15 = vpop.eup %3013  ;;  %v3751_v31 = vpop.f32.mrf.mxu1 }
 0x44f   : > { %v1369_v10 = vadd.f32 %v1368_v40, %v1367_v43  ;;  %v1645_v14 = vpop.f32.mrf.mxu0  ;;  %v3774_v40 = vrot.slane %v2621_v26, %v3961_v19  ;;  %v1644_v43 = vadd.f32 %v1643_v23, %v3766_v28 }
 0x451   : > { %3015 = vtanh.f32 %v1369_v10  ;;  %1376 = vst [vmem:[#allocation10] sm:$0xff] %v1369_v10  ;;  %v3745_v13 = vpop.f32.mrf.mxu0 }
 0x453   : > { %v3749_v11 = vpop.f32.mrf.mxu0 }
 0x45e   : > { %v3016_v29 = vpop.eup %3015 }
 0x45f   : > { %v1371_v30 = vmul.f32 %v3016_v29, %v3014_v15  ;;  %v1646_v29 = vadd.f32 %v1645_v14, %v3774_v40  ;;  %v3965_v14 = vsub.s32 2, %v3957_v12 }
 0x461   : > { %v1372_v16 = vpack.c.bf16 %v1371_v30, %v1371_v30  ;;  %1375 = vst [vmem:[#allocation9] sm:$0xff] %v1371_v30 }
 0x463   : > { %1374 = vst [vmem:[#allocation3 + $0xc] sm:$0xf] %v1372_v16 }
 0x46a   : > { %v2940_v22 = vld [vmem:[#allocation3 + $0x8] sm:$0xff]  }
 0x46b   : > { %1652 = vmatmul.mubr.bf16.gmra.mxu0 %v2940_v22  ;;  %1705 = vmatmul.mubr.bf16.gmra.mxu1 %v2940_v22 }
 0x46c   : > { %1965 = vmatprep.mubr.bf16.mxu0 %v3948_v8  ;;  %2006 = vmatprep.mubr.bf16.mxu1 %v3948_v8 }
 0x473   : > { %1966 = vmatmul.mubr.bf16.vlgmr.msra.gmra.mxu0 %v1772_v37  ;;  %2007 = vmatmul.mubr.bf16.vlgmr.msra.gmra.mxu1 %v1772_v37 }
 0x474   : > { %2050 = vmatpush1.bf16.msra.mxu0 %v3610_v46  ;;  %2091 = vmatpush1.bf16.msra.mxu1 %v3612_v47 }
 0x475   : > { %2051 = vmatprep.subr.bf16.mxu0 %v3618_v48  ;;  %2092 = vmatprep.subr.bf16.mxu1 %v3620_v50 }
 0x476   : > { %2081 = vmatprep.mubr.bf16.mxu0 %v3948_v8  ;;  %2122 = vmatprep.mubr.bf16.mxu1 %v3948_v8 }
 0x478   : > { %2052 = vmatpush1.bf16.msra.mxu0 %v3622_v51  ;;  %2093 = vmatpush1.bf16.msra.mxu1 %v3624_v52 }
 0x479   : > { %2053 = vmatprep.subr.bf16.mxu0 %v3630_v53  ;;  %2094 = vmatprep.subr.bf16.mxu1 %v3632_v54 }
 0x47c   : > { %2054 = vmatpush1.bf16.msra.mxu0 %v3634_v55  ;;  %2095 = vmatpush1.bf16.msra.mxu1 %v3636_v56 }
 0x47d   : > { %2055 = vmatprep.subr.bf16.mxu0 %v3642_v57  ;;  %2096 = vmatprep.subr.bf16.mxu1 %v3644_v58 }
 0x480   : > { %2056 = vmatpush1.bf16.msra.mxu0 %v3646_v59  ;;  %2097 = vmatpush1.bf16.msra.mxu1 %v3648_v60 }
 0x481   : > { %2057 = vmatprep.subr.bf16.mxu0 %v3654_v61  ;;  %2098 = vmatprep.subr.bf16.mxu1 %v3656_v62 }
 0x484   : > { %2058 = vmatpush1.bf16.msra.mxu0 %v3658_v63  ;;  %2099 = vmatpush1.bf16.msra.mxu1 %v3660_v0 }
 0x485   : > { %2059 = vmatprep.subr.bf16.mxu0 %v3662_v1  ;;  %2100 = vmatprep.subr.bf16.mxu1 %v3664_v2 }
 0x488   : > { %2060 = vmatpush1.bf16.msra.mxu0 %v3670_v3  ;;  %2101 = vmatpush1.bf16.msra.mxu1 %v3672_v4 }
 0x489   : > { %2061 = vmatprep.subr.bf16.mxu0 %v3678_v5  ;;  %2102 = vmatprep.subr.bf16.mxu1 %v3680_v7 }
 0x48c   : > { %2062 = vmatpush1.bf16.msra.mxu0 %v3682_v35  ;;  %2103 = vmatpush1.bf16.msra.mxu1 %v3684_v25 }
 0x48d   : > { %2063 = vmatprep.subr.bf16.mxu0 %v3686_v33  ;;  %2104 = vmatprep.subr.bf16.mxu1 %v3690_v34 }
 0x490   : > { %2064 = vmatpush1.bf16.msra.mxu0 %v3694_v39  ;;  %2105 = vmatpush1.bf16.msra.mxu1 %v3696_v49 }
 0x491   : > { %2166 = vmatprep.subr.bf16.mxu0 %v3606_v44  ;;  %2207 = vmatprep.subr.bf16.mxu1 %v3608_v45 }
 0x52b   : > { %v3756_v36 = vpop.f32.mrf.mxu0  ;;  %v3758_v9 = vpop.f32.mrf.mxu1 }
 0x52c   : > { %3956 = vst [vmem:[#allocation18_spill] sm:$0xff] %v3758_v9 }
 0x52d   : > { %v3760_v24 = vpop.f32.mrf.mxu0  ;;  %v3762_v21 = vpop.f32.mrf.mxu1 }
 0x52f   : > { %v3768_v17 = vpop.f32.mrf.mxu0  ;;  %v3770_v18 = vpop.f32.mrf.mxu1 }
 0x530   : > { %3959 = vst [vmem:[#allocation19_spill] sm:$0xff] %v3768_v17  ;;  %3960 = vst [vmem:[#allocation17_spill] sm:$0xff] %v3770_v18  ;;  %v3964_v17 = vsub.s32 3, %v3957_v12 }
 0x531   : > { %v3776_v41 = vpop.f32.mrf.mxu0  ;;  %v3778_v42 = vpop.f32.mrf.mxu1 }
 0x532   : > { %3962 = vst [vmem:[#allocation20_spill] sm:$0xff] %v3776_v41  ;;  %3963 = vst [vmem:[#allocation22_spill] sm:$0xff] %v3778_v42  ;;  %v3784_v41 = vrot.slane %v2621_v26, %v3964_v17 }
 0x533   : > { %v1967_v10 = vpop.f32.mrf.mxu0  ;;  %v2008_v15 = vpop.f32.mrf.mxu1 }
 0x534   : > { %v2015_v30 = vadd.f32 %v1967_v10, %v1644_v43  ;;  %v1699_v23 = vadd.f32 %v1698_v6, %v3784_v41  ;;  %v3789_v43 = vrot.slane %v2621_v26, %v3965_v14 }
 0x535   : > { %v1969_v16 = vpop.f32.mrf.mxu0  ;;  %v2010_v22 = vpop.f32.mrf.mxu1 }
 0x536   : > { %v2688_v20 = vmul.f32 -1.442695, %v2015_v30  ;;  %v2016_v37 = vadd.f32 %v1969_v16, %v1646_v29  ;;  %v2018_v10 = vadd.f32 %v2010_v22, %v1699_v23  ;;  %v1697_v29 = vadd.f32 %v1696_v38, %v3789_v43 }
 0x537   : > { %v1971_v32 = vpop.f32.mrf.mxu0  ;;  %v2012_v18 = vpop.f32.mrf.mxu1 }
 0x538   : > { %3017 = vpow2.f32 %v2688_v20  ;;  %v2689_v19 = vmul.f32 -1.442695, %v2016_v37  ;;  %v2690_v30 = vmul.f32 -1.442695, %v2018_v10  ;;  %v2017_v16 = vadd.f32 %v2008_v15, %v1697_v29 }
 0x539   : > { %v1972_v42 = vpop.f32.mrf.mxu0  ;;  %v2013_v9 = vpop.f32.mrf.mxu1  ;;  %v1648_v29 = vadd.f32 %v3745_v13, %v3766_v28 }
 0x53a   : > { %3019 = vpow2.f32 %v2689_v19  ;;  %v1767_v42 = vld [vmem:[#allocation10 + $0x8] sm:$0xff] }
 0x53b   : > { %3021 = vpow2.f32 %v2690_v30 }
 0x545   : > { %v3018_v18 = vpop.eup %3017 }
 0x546   : > { %v2022_v20 = vadd.f32 1.0, %v3018_v18 }
 0x547   : > { %v3020_v37 = vpop.eup %3019 }
 0x548   : > { %3023 = vrcp.f32 %v2022_v20  ;;  %v2028_v17 = vadd.f32 1.0, %v3020_v37  ;;  %v3022_v9 = vpop.eup %3021 }
 0x549   : > { %3025 = vtanh.f32 %v2017_v16  ;;  %v2035_v32 = vadd.f32 1.0, %v3022_v9  ;;  %v1650_v16 = vadd.f32 %v3749_v11, %v3774_v40 }
 0x54a   : > { %3027 = vrcp.f32 %v2028_v17 }
 0x54b   : > { %3029 = vrcp.f32 %v2035_v32 }
 0x555   : > { %v3024_v6 = vpop.eup %3023 }
 0x556   : > { %v3026_v12 = vpop.eup %3025 }
 0x557   : > { %v3028_v26 = vpop.eup %3027  ;;  %v2039_v22 = vmul.f32 %v3026_v12, %v3024_v6 }
 0x558   : > { %v2038_v19 = vmul.f32 %v3028_v26, %v1767_v42  ;;  %v3030_v15 = vpop.eup %3029 }
 0x55a   : > { %v3792_v38 = vadd.f32 %v2039_v22, %v2038_v19  ;;  %v1701_v22 = vadd.f32 %v3747_v27, %v3789_v43 }
 0x55c   : > { %3031 = vtanh.f32 %v3792_v38 }
 0x569   : > { %v3032_v23 = vpop.eup %3031 }
 0x56a   : > { %v2042_v14 = vmul.f32 %v3032_v23, %v3030_v15 }
 0x56c   : > { %v2043_v10 = vpack.c.bf16 %v2042_v14, %v2042_v14 }
 0x56e   : > { %2044 = vst [vmem:[%s3320_s30] sm:$0xf] %v2043_v10  ;;  %2082 = vmatmul.mubr.bf16.vlgmr.msra.gmra.mxu0 %v2043_v10  ;;  %2123 = vmatmul.mubr.bf16.vlgmr.msra.gmra.mxu1 %v2043_v10 }
 0x56f   : > { %2167 = vmatpush1.bf16.msra.mxu0 %v3610_v46  ;;  %2208 = vmatpush1.bf16.msra.mxu1 %v3612_v47 }
 0x570   : > { %2168 = vmatprep.subr.bf16.mxu0 %v3618_v48  ;;  %2209 = vmatprep.subr.bf16.mxu1 %v3620_v50 }
 0x571   : > { %2198 = vmatprep.mubr.bf16.mxu0 %v3948_v8  ;;  %2239 = vmatprep.mubr.bf16.mxu1 %v3948_v8 }
 0x573   : > { %2169 = vmatpush1.bf16.msra.mxu0 %v3622_v51  ;;  %2210 = vmatpush1.bf16.msra.mxu1 %v3624_v52 }
 0x574   : > { %2170 = vmatprep.subr.bf16.mxu0 %v3630_v53  ;;  %2211 = vmatprep.subr.bf16.mxu1 %v3632_v54 }
 0x577   : > { %2171 = vmatpush1.bf16.msra.mxu0 %v3634_v55  ;;  %2212 = vmatpush1.bf16.msra.mxu1 %v3636_v56 }
 0x578   : > { %2172 = vmatprep.subr.bf16.mxu0 %v3642_v57  ;;  %2213 = vmatprep.subr.bf16.mxu1 %v3644_v58 }
 0x57b   : > { %2173 = vmatpush1.bf16.msra.mxu0 %v3646_v59  ;;  %2214 = vmatpush1.bf16.msra.mxu1 %v3648_v60 }
 0x57c   : > { %2174 = vmatprep.subr.bf16.mxu0 %v3654_v61  ;;  %2215 = vmatprep.subr.bf16.mxu1 %v3656_v62 }
 0x57f   : > { %2175 = vmatpush1.bf16.msra.mxu0 %v3658_v63  ;;  %2216 = vmatpush1.bf16.msra.mxu1 %v3660_v0 }
 0x580   : > { %2176 = vmatprep.subr.bf16.mxu0 %v3662_v1  ;;  %2217 = vmatprep.subr.bf16.mxu1 %v3664_v2 }
 0x583   : > { %2177 = vmatpush1.bf16.msra.mxu0 %v3670_v3  ;;  %2218 = vmatpush1.bf16.msra.mxu1 %v3672_v4 }
 0x584   : > { %2178 = vmatprep.subr.bf16.mxu0 %v3678_v5  ;;  %2219 = vmatprep.subr.bf16.mxu1 %v3680_v7 }
 0x587   : > { %2179 = vmatpush1.bf16.msra.mxu0 %v3682_v35  ;;  %2220 = vmatpush1.bf16.msra.mxu1 %v3684_v25 }
 0x588   : > { %2180 = vmatprep.subr.bf16.mxu0 %v3686_v33  ;;  %2221 = vmatprep.subr.bf16.mxu1 %v3690_v34 }
 0x58b   : > { %2181 = vmatpush1.bf16.msra.mxu0 %v3694_v39  ;;  %2222 = vmatpush1.bf16.msra.mxu1 %v3696_v49 }
 0x58c   : > { %2283 = vmatprep.subr.bf16.mxu0 %v3606_v44  ;;  %2324 = vmatprep.subr.bf16.mxu1 %v3608_v45  ;;  %v1703_v45 = vadd.f32 %v3751_v31, %v3784_v41 }
 0x62e   : > { %v2083_v30 = vpop.f32.mrf.mxu0  ;;  %v2124_v18 = vpop.f32.mrf.mxu1 }
 0x62f   : > { %v2131_v20 = vadd.f32 %v2083_v30, %v1648_v29  ;;  %v2133_v11 = vadd.f32 %v2124_v18, %v1701_v22 }
 0x630   : > { %v2085_v37 = vpop.f32.mrf.mxu0  ;;  %v2126_v17 = vpop.f32.mrf.mxu1 }
 0x631   : > { %v2691_v9 = vmul.f32 -1.442695, %v2131_v20  ;;  %v2132_v6 = vadd.f32 %v2085_v37, %v1650_v16  ;;  %v2134_v13 = vadd.f32 %v2126_v17, %v1703_v45 }
 0x632   : > { %v2087_v42 = vpop.f32.mrf.mxu0  ;;  %v2128_v12 = vpop.f32.mrf.mxu1 }
 0x633   : > { %3033 = vpow2.f32 %v2691_v9  ;;  %v2692_v26 = vmul.f32 -1.442695, %v2132_v6  ;;  %v2693_v19 = vmul.f32 -1.442695, %v2134_v13  ;;  %v3968_v13 = vld [vmem:[#allocation20_spill] sm:$0xff] }
 0x634   : > { %v2088_v44 = vpop.f32.mrf.mxu0  ;;  %v2129_v32 = vpop.f32.mrf.mxu1  ;;  %v1660_v22 = vadd.f32 %v3968_v13, %v3774_v40 }
 0x635   : > { %3035 = vpow2.f32 %v2692_v26  ;;  %v3967_v26 = vld [vmem:[#allocation19_spill] sm:$0xff] }
 0x636   : > { %3037 = vtanh.f32 %v2133_v11  ;;  %v1658_v44 = vadd.f32 %v3967_v26, %v3766_v28 }
 0x637   : > { %3039 = vpow2.f32 %v2693_v19 }
 0x640   : > { %v3034_v15 = vpop.eup %3033 }
 0x641   : > { %v2138_v23 = vadd.f32 1.0, %v3034_v15 }
 0x642   : > { %v3036_v14 = vpop.eup %3035 }
 0x643   : > { %3041 = vrcp.f32 %v2138_v23  ;;  %v2144_v10 = vadd.f32 1.0, %v3036_v14  ;;  %v3038_v29 = vpop.eup %3037 }
 0x644   : > { %v3040_v30 = vpop.eup %3039 }
 0x645   : > { %3043 = vrcp.f32 %v2144_v10  ;;  %v2151_v37 = vadd.f32 1.0, %v3040_v30 }
 0x647   : > { %3045 = vrcp.f32 %v2151_v37 }
 0x650   : > { %v3042_v16 = vpop.eup %3041 }
 0x651   : > { %v2155_v20 = vmul.f32 %v3042_v16, %v3038_v29 }
 0x652   : > { %v3044_v31 = vpop.eup %3043 }
 0x653   : > { %v2154_v17 = vmul.f32 %v3044_v31, %v3792_v38  ;;  %v3969_v31 = vld [vmem:[#allocation22_spill] sm:$0xff] }
 0x654   : > { %v3046_v18 = vpop.eup %3045 }
 0x655   : > { %v3839_v27 = vadd.f32 %v2155_v20, %v2154_v17  ;;  %v3970_v17 = vld [vmem:[#allocation17_spill] sm:$0xff] }
 0x657   : > { %3047 = vtanh.f32 %v3839_v27 }
 0x664   : > { %v3048_v9 = vpop.eup %3047 }
 0x665   : > { %v2158_v6 = vmul.f32 %v3048_v9, %v3046_v18 }
 0x667   : > { %v2159_v42 = vpack.c.bf16 %v2158_v6, %v2158_v6 }
 0x669   : > { %2694 = vst [vmem:[%s3320_s30 + $0x4] sm:$0xf] %v2159_v42  ;;  %2199 = vmatmul.mubr.bf16.vlgmr.msra.gmra.mxu0 %v2159_v42  ;;  %2240 = vmatmul.mubr.bf16.vlgmr.msra.gmra.mxu1 %v2159_v42 }
 0x66a   : > { %2284 = vmatpush1.bf16.msra.mxu0 %v3610_v46  ;;  %2325 = vmatpush1.bf16.msra.mxu1 %v3612_v47 }
 0x66b   : > { %2285 = vmatprep.subr.bf16.mxu0 %v3618_v48  ;;  %2326 = vmatprep.subr.bf16.mxu1 %v3620_v50  ;;  %v1656_v48 = vadd.f32 %v3760_v24, %v3774_v40 }
 0x66c   : > { %2315 = vmatprep.mubr.bf16.mxu0 %v3948_v8  ;;  %2356 = vmatprep.mubr.bf16.mxu1 %v3948_v8  ;;  %v1654_v8 = vadd.f32 %v3756_v36, %v3766_v28  ;;  %v1713_v28 = vadd.f32 %v3969_v31, %v3784_v41 }
 0x66e   : > { %2286 = vmatpush1.bf16.msra.mxu0 %v3622_v51  ;;  %2327 = vmatpush1.bf16.msra.mxu1 %v3624_v52 }
 0x66f   : > { %2287 = vmatprep.subr.bf16.mxu0 %v3630_v53  ;;  %2328 = vmatprep.subr.bf16.mxu1 %v3632_v54 }
 0x672   : > { %2288 = vmatpush1.bf16.msra.mxu0 %v3634_v55  ;;  %2329 = vmatpush1.bf16.msra.mxu1 %v3636_v56 }
 0x673   : > { %2289 = vmatprep.subr.bf16.mxu0 %v3642_v57  ;;  %2330 = vmatprep.subr.bf16.mxu1 %v3644_v58 }
 0x676   : > { %2290 = vmatpush1.bf16.msra.mxu0 %v3646_v59  ;;  %2331 = vmatpush1.bf16.msra.mxu1 %v3648_v60  ;;  %v1709_v60 = vadd.f32 %v3762_v21, %v3784_v41 }
 0x677   : > { %2291 = vmatprep.subr.bf16.mxu0 %v3654_v61  ;;  %2332 = vmatprep.subr.bf16.mxu1 %v3656_v62  ;;  %v3966_v62 = vld [vmem:[#allocation18_spill] sm:$0xff] }
 0x67a   : > { %2292 = vmatpush1.bf16.msra.mxu0 %v3658_v63  ;;  %2333 = vmatpush1.bf16.msra.mxu1 %v3660_v0  ;;  %v1707_v63 = vadd.f32 %v3966_v62, %v3789_v43 }
 0x67b   : > { %2293 = vmatprep.subr.bf16.mxu0 %v3662_v1  ;;  %2334 = vmatprep.subr.bf16.mxu1 %v3664_v2 }
 0x67e   : > { %2294 = vmatpush1.bf16.msra.mxu0 %v3670_v3  ;;  %2335 = vmatpush1.bf16.msra.mxu1 %v3672_v4 }
 0x67f   : > { %2295 = vmatprep.subr.bf16.mxu0 %v3678_v5  ;;  %2336 = vmatprep.subr.bf16.mxu1 %v3680_v7 }
 0x682   : > { %2296 = vmatpush1.bf16.msra.mxu0 %v3682_v35  ;;  %2337 = vmatpush1.bf16.msra.mxu1 %v3684_v25 }
 0x683   : > { %2297 = vmatprep.subr.bf16.mxu0 %v3686_v33  ;;  %2338 = vmatprep.subr.bf16.mxu1 %v3690_v34 }
 0x686   : > { %2298 = vmatpush1.bf16.msra.mxu0 %v3694_v39  ;;  %2339 = vmatpush1.bf16.msra.mxu1 %v3696_v49 }
 0x729   : > { %v2200_v46 = vpop.f32.mrf.mxu0  ;;  %v2241_v47 = vpop.f32.mrf.mxu1 }
 0x72a   : > { %v2248_v50 = vadd.f32 %v2200_v46, %v1654_v8  ;;  %v2250_v0 = vadd.f32 %v2241_v47, %v1707_v63 }
 0x72b   : > { %v2202_v51 = vpop.f32.mrf.mxu0  ;;  %v2243_v52 = vpop.f32.mrf.mxu1 }
 0x72c   : > { %v2695_v53 = vmul.f32 -1.442695, %v2248_v50  ;;  %v2249_v54 = vadd.f32 %v2202_v51, %v1656_v48  ;;  %v2251_v61 = vadd.f32 %v2243_v52, %v1709_v60 }
 0x72d   : > { %v2204_v55 = vpop.f32.mrf.mxu0  ;;  %v2245_v56 = vpop.f32.mrf.mxu1 }
 0x72e   : > { %3049 = vpow2.f32 %v2695_v53  ;;  %v2696_v57 = vmul.f32 -1.442695, %v2249_v54  ;;  %v2697_v1 = vmul.f32 -1.442695, %v2251_v61 }
 0x72f   : > { %v2205_v58 = vpop.f32.mrf.mxu0  ;;  %v2246_v59 = vpop.f32.mrf.mxu1 }
 0x730   : > { %3051 = vpow2.f32 %v2696_v57 }
 0x731   : > { %3053 = vtanh.f32 %v2250_v0 }
 0x732   : > { %3055 = vpow2.f32 %v2697_v1 }
 0x73b   : > { %v3050_v2 = vpop.eup %3049 }
 0x73c   : > { %v2255_v3 = vadd.f32 1.0, %v3050_v2 }
 0x73d   : > { %v3052_v4 = vpop.eup %3051 }
 0x73e   : > { %3057 = vrcp.f32 %v2255_v3  ;;  %v2261_v5 = vadd.f32 1.0, %v3052_v4  ;;  %v3054_v7 = vpop.eup %3053 }
 0x73f   : > { %v3056_v35 = vpop.eup %3055 }
 0x740   : > { %3059 = vrcp.f32 %v2261_v5  ;;  %v2268_v39 = vadd.f32 1.0, %v3056_v35 }
 0x742   : > { %3061 = vrcp.f32 %v2268_v39 }
 0x74b   : > { %v3058_v25 = vpop.eup %3057 }
 0x74c   : > { %v2272_v33 = vmul.f32 %v3058_v25, %v3054_v7 }
 0x74d   : > { %v3060_v34 = vpop.eup %3059 }
 0x74e   : > { %v2271_v49 = vmul.f32 %v3060_v34, %v3839_v27  ;;  %v1711_v27 = vadd.f32 %v3970_v17, %v3789_v43 }
 0x74f   : > { %v3062_v24 = vpop.eup %3061 }
 0x750   : > { %v2273_v36 = vadd.f32 %v2272_v33, %v2271_v49 }
 0x752   : > { %3063 = vtanh.f32 %v2273_v36 }
 0x75f   : > { %v3064_v21 = vpop.eup %3063 }
 0x760   : > { %v2275_v38 = vmul.f32 %v3064_v21, %v3062_v24 }
 0x762   : > { %v2276_v12 = vpack.c.bf16 %v2275_v38, %v2275_v38 }
 0x764   : > { %2698 = vst [vmem:[%s3320_s30 + $0x8] sm:$0xf] %v2276_v12  ;;  %2316 = vmatmul.mubr.bf16.vlgmr.msra.gmra.mxu0 %v2276_v12  ;;  %2357 = vmatmul.mubr.bf16.vlgmr.msra.gmra.mxu1 %v2276_v12 }
 0x824   : > { %v2317_v32 = vpop.f32.mrf.mxu0  ;;  %v2358_v45 = vpop.f32.mrf.mxu1 }
 0x825   : > { %v2365_v11 = vadd.f32 %v2317_v32, %v1658_v44  ;;  %v2367_v40 = vadd.f32 %v2358_v45, %v1711_v27 }
 0x826   : > { %v2319_v19 = vpop.f32.mrf.mxu0  ;;  %v2360_v15 = vpop.f32.mrf.mxu1 }
 0x827   : > { %v2699_v23 = vmul.f32 -1.442695, %v2365_v11  ;;  %v2366_v14 = vadd.f32 %v2319_v19, %v1660_v22  ;;  %v2368_v37 = vadd.f32 %v2360_v15, %v1713_v28 }
 0x828   : > { %v2321_v10 = vpop.f32.mrf.mxu0  ;;  %v2362_v29 = vpop.f32.mrf.mxu1 }
 0x829   : > { %3065 = vpow2.f32 %v2699_v23  ;;  %v2700_v30 = vmul.f32 -1.442695, %v2366_v14  ;;  %v2701_v18 = vmul.f32 -1.442695, %v2368_v37 }
 0x82a   : > { %v2322_v16 = vpop.f32.mrf.mxu0  ;;  %v2363_v20 = vpop.f32.mrf.mxu1 }
 0x82b   : > { %3067 = vpow2.f32 %v2700_v30 }
 0x82c   : > { %3069 = vtanh.f32 %v2367_v40 }
 0x82d   : > { %3071 = vpow2.f32 %v2701_v18 }
 0x836   : > { %v3066_v9 = vpop.eup %3065 }
 0x837   : > { %v2372_v6 = vadd.f32 1.0, %v3066_v9 }
 0x838   : > { %v3068_v42 = vpop.eup %3067 }
 0x839   : > { %3073 = vrcp.f32 %v2372_v6  ;;  %v2378_v8 = vadd.f32 1.0, %v3068_v42  ;;  %v3070_v46 = vpop.eup %3069 }
 0x83a   : > { %v3072_v47 = vpop.eup %3071 }
 0x83b   : > { %3075 = vrcp.f32 %v2378_v8  ;;  %v2385_v51 = vadd.f32 1.0, %v3072_v47 }
 0x83d   : > { %3077 = vrcp.f32 %v2385_v51 }
 0x846   : > { %v3074_v48 = vpop.eup %3073 }
 0x847   : > { %v2389_v41 = vmul.f32 %v3074_v48, %v3070_v46 }
 0x848   : > { %v3076_v50 = vpop.eup %3075 }
 0x849   : > { %v2388_v43 = vmul.f32 %v3076_v50, %v2273_v36 }
 0x84b   : > { %v2390_v52 = vadd.f32 %v2389_v41, %v2388_v43 }
 0x84d   : > { %3079 = vtanh.f32 %v2390_v52  ;;  %2397 = vst [vmem:[#allocation10 + $0x8] sm:$0xff] %v2390_v52 }
 0x84e   : > { %3146 = shalt.err (!%p3143_p5)
}
 0x84f   : > { %s3211_s24 = smov 128   ;;  %s3212_s25 = smov 8   ;;  %v3078_v53 = vpop.eup %3077 }
 0x850   : > { %2720 = dma.vmem_to_hbm [thread:$0]  (%p2736_p4), %s2427_s22, 256, %s3928_s8, [#allocation11], %s3211_s24, %s3211_s24, %s3212_s25  }
 0x851   : > { %s3213_s9 = smov [#allocation9]  }
 0x852   : > { %s2413_s10 = sshll.u32 %s3213_s9, 4  ;;  %s2414_s10 = int_to_ptr.vmem [resolvable:$true] %s2413_s10 }
 0x853   : > { %s3157_s11 = scalar_lea.vmem %s2414_s10, 256  ;;  %p3164_p10 = scmp.lt.s32.totalorder %s2414_s10, %s2414_s10 }
 0x854   : > { %p3158_p8 = scmp.ne.s32.totalorder %s2414_s10, %s3157_s11  ;;  %p3165_p2 = scmp.lt.s32.totalorder %s3157_s11, %s3157_s11 }
 0x856   : > { %p3159_p9 = pnand %p3158_p8, %p2736_p4  ;;  %p3166_p3 = por %p3165_p2, %p3164_p10 }
 0x858   : > { %p3160_p11 = pneg %p3159_p9 }
 0x85a   : > { %v3080_v54 = vpop.eup %3079  ;;  %p3167_p6 = pnand %p3166_p3, %p3160_p11 }
 0x85b   : > { %v2392_v55 = vmul.f32 %v3080_v54, %v3078_v53 }
 0x85d   : > { %v2393_v56 = vpack.c.bf16 %v2392_v55, %v2392_v55  ;;  %2396 = vst [vmem:[#allocation9 + $0x8] sm:$0xff] %v2392_v55 }
 0x85e   : > { %3170 = shalt.err (!%p3167_p6)
}
 0x85f   : > { %2718 = dma.vmem_to_hbm [thread:$0]  (%p2736_p4), %s2414_s10, 256, %s3927_s7, [#allocation6], %s3211_s24, %s3211_s24, %s3212_s25  }
 0x860   : > { %2702 = vst [vmem:[%s3320_s30 + $0xc] sm:$0xf] %v2393_v56 }
 0x861   : > { %3194 = dma.done.wait (%p2736_p4), [#allocation6], 256  }
 0x862   : > { %3196 = vsyncadd (%p2736_p4), [#allocation6], 4294967040 }
 0x863   : > { %3198 = dma.done.wait (%p2736_p4), [#allocation11], 256  }
 0x864   : > { %3200 = vsyncadd (%p2736_p4), [#allocation11], 4294967040 }
 0x865 PF: > { %s23_s27 = sadd.s32 1, %s3203_s27  }
 0x866   : > { %p20_p7 = scmp.ge.s32.totalorder %s23_s27, 4  }
 0x868   :  { %22 = sbr.rel (!%p20_p7) target bundleno = 4 (0x4), region = 119 }
 0x86d   :  { %2454 = vsyncpa [#allocation5], 1 }
 0x86e   :  { %2456 = vsyncpa [#allocation5 + $0x1], 1 }
 0x86f   :  { %2457 = vsyncpa [#allocation8], 1 }
 0x870   :  { %2458 = vsyncpa [#allocation6], 1 }
 0x871   :  { %2460 = vsyncpa [#allocation6 + $0x1], 1 }
 0x872   :  { %2461 = vsyncpa [#allocation11], 1 }

</bundles_post_ra>
